<compile_context>
chip_gen: v6e
topology: v6e:2x2x1
jax: 0.10.0
libtpu: 0.0.40
codegen_flags: <defaults>
</compile_context>

<pallas_src>
import functools

import jax
import jax.numpy as jnp
import numpy as np
from jax import lax
from jax.experimental import pallas as pl
from jax.experimental.pallas import tpu as pltpu


# ------------------------------ kernel body --------------------------------

def _bottleneck_kernel(mask_ref, x_ref, w1_ref, b1_ref, w2_ref, b2_ref,
                       w3_ref, b3_ref, o_ref, patch_ref, *, W, cmid_p):
    """One packed block: x_ref (1, Cin, Pb) -> o_ref (1, Cout, Pb)."""
    Pb = x_ref.shape[-1]

    # ---- conv1 (1x1) + folded bn1 + relu ----------------------------------
    xb = x_ref[0].astype(jnp.bfloat16)                       # (Cin, Pb) bf16
    y1 = jnp.dot(w1_ref[...], xb, preferred_element_type=jnp.float32)
    y1 = jnp.maximum(y1 + b1_ref[...], 0.0)                  # (Cmid_p, Pb) f32

    # ---- conv2 (3x3, pad=1, stride=1) as ONE im2col matmul ----------------
    # Nine lane-rolls (XLU slot, overlaps MXU) masked by precomputed (1, Pb)
    # border masks; each tap goes straight into the bf16 VMEM scratch so only
    # one tap is live at a time.  Tap order (dh, dw) row-major matches w2_ref.
    t = 0
    for dh in (-1, 0, 1):
        for dw in (-1, 0, 1):
            amt = (-(dh * W + dw)) % Pb
            piece = pltpu.roll(y1, amt, axis=1) if amt else y1
            if not (dh == 0 and dw == 0):
                piece = piece * mask_ref[t]                  # (1, Pb) broadcast
            patch_ref[t * cmid_p:(t + 1) * cmid_p, :] = piece.astype(jnp.bfloat16)
            t += 1

    y2 = jnp.dot(w2_ref[...], patch_ref[...],
                 preferred_element_type=jnp.float32)         # (Cmid_p, Pb)
    y2 = jnp.maximum(y2 + b2_ref[...], 0.0)

    # ---- conv3 (1x1, expansion 4) + folded bn3 + relu ----------------------
    y3 = jnp.dot(w3_ref[...], y2.astype(jnp.bfloat16),
                 preferred_element_type=jnp.float32)         # (Cout, Pb)
    y3 = jnp.maximum(y3 + b3_ref[...], 0.0)

    # ---- residual add (late f32 re-read of resident input) + final relu ----
    o_ref[0] = jnp.maximum(y3 + x_ref[0], 0.0).astype(o_ref.dtype)


# ------------------------------ host helpers --------------------------------

def _choose_batch_pack(N, P):
    """Images packed per grid step (divisor of N): aim for lane width Nb*P a
    multiple of 128 and >= 512, while keeping >= 2 grid steps when possible."""
    best = 1
    for nb in range(1, N + 1):
        if N % nb:
            continue
        lanes_ok = (nb * P) % 128 == 0
        if lanes_ok and (best * P) % 128 != 0:
            best = nb
        if lanes_ok and nb * P >= 512 and N // nb >= 2:
            return nb
    return best


def _make_tap_masks(H, W, nb):
    """(9, 1, nb*H*W) f32 border masks, per-image (pos % P) so packed images
    never leak into each other through the lane roll."""
    P = H * W
    pos = np.arange(nb * P) % P
    row, col = pos // W, pos % W
    masks = []
    for dh in (-1, 0, 1):
        for dw in (-1, 0, 1):
            valid = np.ones(nb * P, dtype=bool)
            if dh < 0:
                valid &= row >= -dh
            elif dh > 0:
                valid &= row < H - dh
            if dw < 0:
                valid &= col >= -dw
            elif dw > 0:
                valid &= col < W - dw
            masks.append(valid)
    return jnp.asarray(np.stack(masks).astype(np.float32).reshape(9, 1, nb * P))


def _pack(x_nchw, nb):
    N, C, H, W = x_nchw.shape
    G, P = N // nb, H * W
    if nb == 1:
        return x_nchw.reshape(G, C, P)
    # Layout plumbing only: (G, nb, C, P) -> (G, C, nb*P) lane-dense slab.
    return x_nchw.reshape(G, nb, C, P).transpose(0, 2, 1, 3).reshape(G, C, nb * P)


def _unpack(y, nb, N, C, H, W):
    G, P = N // nb, H * W
    if nb == 1:
        return y.reshape(N, C, H, W)
    return y.reshape(G, C, nb, P).transpose(0, 2, 1, 3).reshape(N, C, H, W)


def _pick_vmem_limit():
    """~75% of physical VMEM (v7x: 48 MiB, v5e/v6e: 96 MiB); conservative
    32 MiB fallback if the hardware query is unavailable."""
    try:
        cap = pltpu.get_tpu_info().vmem_capacity_bytes
        return max(32 * 1024 * 1024, min(int(cap) * 3 // 4, 96 * 1024 * 1024))
    except Exception:
        return 32 * 1024 * 1024


# ------------------------------ entry point ---------------------------------

def bottleneck_pallas(x_nchw, kernel_params):
    """x_nchw: (N, Cin, H, W) float32. Returns (N, Cout, H, W), Cout == Cin."""
    N, cin, H, W = x_nchw.shape
    P = H * W
    w1, b1, w2, b2, w3, b3 = kernel_params
    cmid_p = w1.shape[0]
    cout = w3.shape[0]
    assert cout == cin, "residual add requires in_channels == 4*interim_channels"

    nb = _choose_batch_pack(N, P)
    Pb, G = nb * P, N // nb
    xp = _pack(x_nchw, nb)                       # (G, Cin, Pb) lane-dense
    masks = _make_tap_masks(H, W, nb)            # (9, 1, Pb) f32, grid-invariant

    flops = int(2 * G * Pb * (cin * cmid_p + 9 * cmid_p * cmid_p + cmid_p * cout))
    # Constant index_maps -> weights/biases/masks are fetched once, not per step.
    bytes_accessed = int((xp.size + G * cout * Pb) * 4
                         + (w1.size + w2.size + w3.size) * 2
                         + (b1.size + b2.size + b3.size) * 4
                         + masks.size * 4)

    kern = functools.partial(_bottleneck_kernel, W=W, cmid_p=cmid_p)

    def run(buffered):
        def const_spec(shape):
            idx = lambda n, _r=len(shape): (0,) * _r
            if buffered:
                # Single-buffer grid-invariant operands: no second resident copy
                # of w2/w3 in VMEM (matters most on v7x's 64 MiB).
                return pl.BlockSpec(shape, idx, pipeline_mode=pl.Buffered(1))
            return pl.BlockSpec(shape, idx)

        return pl.pallas_call(
            kern,
            out_shape=jax.ShapeDtypeStruct((G, cout, Pb), x_nchw.dtype),
            grid=(G,),
            in_specs=[
                const_spec(masks.shape),
                pl.BlockSpec((1, cin, Pb), lambda n: (n, 0, 0)),
                const_spec(w1.shape), const_spec(b1.shape),
                const_spec(w2.shape), const_spec(b2.shape),
                const_spec(w3.shape), const_spec(b3.shape),
            ],
            out_specs=pl.BlockSpec((1, cout, Pb), lambda n: (n, 0, 0)),
            scratch_shapes=[pltpu.VMEM((9 * cmid_p, Pb), jnp.bfloat16)],
            compiler_params=pltpu.CompilerParams(
                dimension_semantics=("parallel",),
                vmem_limit_bytes=_pick_vmem_limit()),
            cost_estimate=pl.CostEstimate(
                flops=flops, transcendentals=0, bytes_accessed=bytes_accessed),
        )(masks, xp, w1, b1, w2, b2, w3, b3)

    try:
        out = jax.block_until_ready(run(buffered=True))
    except Exception:
        # Fallback if this JAX build rejects pipeline_mode=pl.Buffered(1).
        out = jax.block_until_ready(run(buffered=False))

    return _unpack(out, nb, N, cout, H, W)


# --------------------------- parameter handling ---------------------------

def make_raw_params(key, in_channels, interim_channels):
    """Deterministic synthetic PyTorch-style params (OIHW conv weights, BN)."""
    cin, cmid = in_channels, interim_channels
    cout = 4 * cmid
    keys = jax.random.split(key, 6)
    w1 = 0.1 * jax.random.normal(keys[0], (cmid, cin, 1, 1), jnp.float32)
    w2 = 0.1 * jax.random.normal(keys[1], (cmid, cmid, 3, 3), jnp.float32)
    w3 = 0.1 * jax.random.normal(keys[2], (cout, cmid, 1, 1), jnp.float32)

    def bn(k, c):
        ks = jax.random.split(k, 4)
        gamma = 1.0 + 0.1 * jax.random.normal(ks[0], (c,), jnp.float32)
        beta = 0.1 * jax.random.normal(ks[1], (c,), jnp.float32)
        mean = 0.1 * jax.random.normal(ks[2], (c,), jnp.float32)
        var = jnp.abs(1.0 + 0.1 * jax.random.normal(ks[3], (c,), jnp.float32))
        return gamma, beta, mean, var

    return dict(w1=w1, bn1=bn(keys[3], cmid),
                w2=w2, bn2=bn(keys[4], cmid),
                w3=w3, bn3=bn(keys[5], cout))


def _fold_bn(gamma, beta, mean, var, eps=1e-5):
    scale = gamma / jnp.sqrt(var + eps)
    bias = beta - mean * scale
    return scale, bias


def prepare_kernel_params(raw, sublane=16):
    """Fold eval-mode BN into conv weights, im2col-reshape conv2, zero-pad the
    interim channels to a multiple of 16 (bf16 sublane packing), cast to bf16."""
    w1, w2, w3 = raw["w1"], raw["w2"], raw["w3"]
    cmid, cin = w1.shape[0], w1.shape[1]
    cout = w3.shape[0]
    cmid_p = ((cmid + sublane - 1) // sublane) * sublane

    s1, b1 = _fold_bn(*raw["bn1"])
    s2, b2 = _fold_bn(*raw["bn2"])
    s3, b3 = _fold_bn(*raw["bn3"])

    # conv1: (Cmid, Cin, 1, 1) -> (Cmid_p, Cin), BN1 scale folded per out-chan.
    w1m = w1[:, :, 0, 0] * s1[:, None]
    w1m = jnp.zeros((cmid_p, cin), jnp.float32).at[:cmid].set(w1m)
    b1v = jnp.zeros((cmid_p, 1), jnp.float32).at[:cmid, 0].set(b1)

    # conv2: (Cmid, Cmid, 3, 3) -> (Cmid_p, 9*Cmid_p) im2col layout
    #        [o, (kh*3+kw)*Cmid_p + i], BN2 scale folded per out-chan.
    w2f = w2 * s2[:, None, None, None]
    w2p = jnp.zeros((cmid_p, cmid_p, 3, 3), jnp.float32).at[:cmid, :cmid].set(w2f)
    w2m = jnp.transpose(w2p, (0, 2, 3, 1)).reshape(cmid_p, 9 * cmid_p)
    b2v = jnp.zeros((cmid_p, 1), jnp.float32).at[:cmid, 0].set(b2)

    # conv3: (Cout, Cmid, 1, 1) -> (Cout, Cmid_p), BN3 scale folded per out-chan.
    w3m = w3[:, :, 0, 0] * s3[:, None]
    w3m = jnp.zeros((cout, cmid_p), jnp.float32).at[:, :cmid].set(w3m)
    b3v = b3[:, None]

    bf = lambda a: a.astype(jnp.bfloat16)
    return (bf(w1m), b1v, bf(w2m), b2v, bf(w3m), b3v)


# ------------------------------- reference --------------------------------

def reference_forward(x_nchw, raw):
    """Pure-JAX NCHW reference (lax convs) with BN folded in f32 and the same
    bf16 quantization points as the kernel (weights + conv inputs)."""
    relu = lambda v: jnp.maximum(v, 0.0)
    bf = lambda a: a.astype(jnp.bfloat16)

    def conv(x, w_oihw, padding):
        return lax.conv_general_dilated(
            bf(x), bf(w_oihw), window_strides=(1, 1), padding=padding,
            dimension_numbers=("NCHW", "OIHW", "NCHW"),
            preferred_element_type=jnp.float32)

    s1, b1 = _fold_bn(*raw["bn1"])
    s2, b2 = _fold_bn(*raw["bn2"])
    s3, b3 = _fold_bn(*raw["bn3"])
    w1 = raw["w1"] * s1[:, None, None, None]
    w2 = raw["w2"] * s2[:, None, None, None]
    w3 = raw["w3"] * s3[:, None, None, None]

    x = x_nchw.astype(jnp.float32)
    y = relu(conv(x, w1, "VALID") + b1[None, :, None, None])
    y = relu(conv(y, w2, ((1, 1), (1, 1))) + b2[None, :, None, None])
    y = relu(conv(y, w3, "VALID") + b3[None, :, None, None])
    return relu(y + x)     # module applies relu after bn3 AND after the add


if __name__ == "__main__":
    # Small shapes consistent with the module: interim=4 -> in_channels=16.
    N, C_in, H, W = 2, 16, 16, 16
    interim = 4

    key = jax.random.PRNGKey(0)
    kx, kp = jax.random.split(key)
    x_nchw = jax.random.normal(kx, (N, C_in, H, W), jnp.float32)   # PyTorch NCHW
    raw = make_raw_params(kp, C_in, interim)
    kparams = prepare_kernel_params(raw)

    out = bottleneck_pallas(x_nchw, kparams)
    out = jax.block_until_ready(out)

    ref = reference_forward(x_nchw, raw)
    np.testing.assert_allclose(np.asarray(out), np.asarray(ref),
                               rtol=1e-2, atol=1e-2)

    print("KERNEL_OK")
</pallas_src>

<mosaic_0001>
module attributes {stable_mosaic.version = 11 : i64} {
  func.func @_bottleneck_kernel(%arg0: i32, %arg1: memref<9x1x256xf32, #tpu.memory_space<vmem>>, %arg2: memref<1x16x256xf32, #tpu.memory_space<vmem>>, %arg3: memref<16x16xbf16, #tpu.memory_space<vmem>>, %arg4: memref<16x1xf32, #tpu.memory_space<vmem>>, %arg5: memref<16x144xbf16, #tpu.memory_space<vmem>>, %arg6: memref<16x1xf32, #tpu.memory_space<vmem>>, %arg7: memref<16x16xbf16, #tpu.memory_space<vmem>>, %arg8: memref<16x1xf32, #tpu.memory_space<vmem>>, %arg9: memref<1x16x256xf32, #tpu.memory_space<vmem>>, %arg10: memref<144x256xbf16, #tpu.memory_space<vmem>>) attributes {dimension_semantics = [#tpu.dimension_semantics<parallel>], iteration_bounds = array<i64: 2>, scalar_prefetch = 0 : i64, scratch_operands = 1 : i64, tpu.core_type = #tpu.core_type<tc>, window_params = [{pipeline_mode = #tpu.pipeline_mode<synchronous>, transform_indices = @transform_0, window_bounds = array<i64: 9, 1, 256>}, {transform_indices = @transform_1, window_bounds = array<i64: 1, 16, 256>}, {pipeline_mode = #tpu.pipeline_mode<synchronous>, transform_indices = @transform_2, window_bounds = array<i64: 16, 16>}, {pipeline_mode = #tpu.pipeline_mode<synchronous>, transform_indices = @transform_3, window_bounds = array<i64: 16, 1>}, {pipeline_mode = #tpu.pipeline_mode<synchronous>, transform_indices = @transform_4, window_bounds = array<i64: 16, 144>}, {pipeline_mode = #tpu.pipeline_mode<synchronous>, transform_indices = @transform_5, window_bounds = array<i64: 16, 1>}, {pipeline_mode = #tpu.pipeline_mode<synchronous>, transform_indices = @transform_6, window_bounds = array<i64: 16, 16>}, {pipeline_mode = #tpu.pipeline_mode<synchronous>, transform_indices = @transform_7, window_bounds = array<i64: 16, 1>}, {transform_indices = @transform_8, window_bounds = array<i64: 1, 16, 256>}]} {
    %c0 = arith.constant 0 : index
    %c0_0 = arith.constant 0 : index
    %c0_1 = arith.constant 0 : index
    %0 = vector.load %arg2[%c0, %c0_0, %c0_1] : memref<1x16x256xf32, #tpu.memory_space<vmem>>, vector<1x16x256xf32>
    %1 = vector.shape_cast %0 : vector<1x16x256xf32> to vector<16x256xf32>
    %2 = arith.truncf %1 : vector<16x256xf32> to vector<16x256xbf16>
    %c0_2 = arith.constant 0 : index
    %c0_3 = arith.constant 0 : index
    %3 = vector.load %arg3[%c0_2, %c0_3] : memref<16x16xbf16, #tpu.memory_space<vmem>>, vector<16x16xbf16>
    %cst = arith.constant dense<0.000000e+00> : vector<16x256xf32>
    %4 = tpu.matmul %3, %2, %cst {dimension_numbers = #tpu.dot_dimension_numbers<[1], [0], [0], [1], [0, 0, 1, 1], [], []>} : vector<16x16xbf16>, vector<16x256xbf16>, vector<16x256xf32> -> vector<16x256xf32>
    %c0_4 = arith.constant 0 : index
    %c0_5 = arith.constant 0 : index
    %5 = vector.load %arg4[%c0_4, %c0_5] : memref<16x1xf32, #tpu.memory_space<vmem>>, vector<16x1xf32>
    %6 = vector.broadcast %5 : vector<16x1xf32> to vector<16x256xf32>
    %7 = arith.addf %4, %6 : vector<16x256xf32>
    %cst_6 = arith.constant 0.000000e+00 : f32
    %8 = vector.broadcast %cst_6 : f32 to vector<16x256xf32>
    %9 = arith.maximumf %7, %8 : vector<16x256xf32>
    %c17_i32 = arith.constant 17 : i32
    %10 = tpu.dynamic_rotate %9 by %c17_i32 dim 1 : vector<16x256xf32>, i32 -> vector<16x256xf32>
    %c0_7 = arith.constant 0 : index
    %c0_8 = arith.constant 0 : index
    %c0_9 = arith.constant 0 : index
    %11 = vector.load %arg1[%c0_7, %c0_8, %c0_9] : memref<9x1x256xf32, #tpu.memory_space<vmem>>, vector<1x1x256xf32>
    %12 = vector.shape_cast %11 : vector<1x1x256xf32> to vector<1x256xf32>
    %13 = vector.broadcast %12 : vector<1x256xf32> to vector<16x256xf32>
    %14 = arith.mulf %10, %13 : vector<16x256xf32>
    %15 = arith.truncf %14 : vector<16x256xf32> to vector<16x256xbf16>
    %c0_10 = arith.constant 0 : index
    %c0_11 = arith.constant 0 : index
    %16 = vector.load %arg10[%c0_10, %c0_11] : memref<144x256xbf16, #tpu.memory_space<vmem>>, vector<16x256xbf16>
    tpu.vector_store %arg10[%c0_10, %c0_11], %15 {strides = array<i32>} : memref<144x256xbf16, #tpu.memory_space<vmem>>, vector<16x256xbf16>,
    %c16_i32 = arith.constant 16 : i32
    %17 = tpu.dynamic_rotate %9 by %c16_i32 dim 1 : vector<16x256xf32>, i32 -> vector<16x256xf32>
    %c1 = arith.constant 1 : index
    %c0_12 = arith.constant 0 : index
    %c0_13 = arith.constant 0 : index
    %18 = vector.load %arg1[%c1, %c0_12, %c0_13] : memref<9x1x256xf32, #tpu.memory_space<vmem>>, vector<1x1x256xf32>
    %19 = vector.shape_cast %18 : vector<1x1x256xf32> to vector<1x256xf32>
    %20 = vector.broadcast %19 : vector<1x256xf32> to vector<16x256xf32>
    %21 = arith.mulf %17, %20 : vector<16x256xf32>
    %22 = arith.truncf %21 : vector<16x256xf32> to vector<16x256xbf16>
    %c16 = arith.constant 16 : index
    %c0_14 = arith.constant 0 : index
    %23 = vector.load %arg10[%c16, %c0_14] : memref<144x256xbf16, #tpu.memory_space<vmem>>, vector<16x256xbf16>
    tpu.vector_store %arg10[%c16, %c0_14], %22 {strides = array<i32>} : memref<144x256xbf16, #tpu.memory_space<vmem>>, vector<16x256xbf16>,
    %c15_i32 = arith.constant 15 : i32
    %24 = tpu.dynamic_rotate %9 by %c15_i32 dim 1 : vector<16x256xf32>, i32 -> vector<16x256xf32>
    %c2 = arith.constant 2 : index
    %c0_15 = arith.constant 0 : index
    %c0_16 = arith.constant 0 : index
    %25 = vector.load %arg1[%c2, %c0_15, %c0_16] : memref<9x1x256xf32, #tpu.memory_space<vmem>>, vector<1x1x256xf32>
    %26 = vector.shape_cast %25 : vector<1x1x256xf32> to vector<1x256xf32>
    %27 = vector.broadcast %26 : vector<1x256xf32> to vector<16x256xf32>
    %28 = arith.mulf %24, %27 : vector<16x256xf32>
    %29 = arith.truncf %28 : vector<16x256xf32> to vector<16x256xbf16>
    %c32 = arith.constant 32 : index
    %c0_17 = arith.constant 0 : index
    %30 = vector.load %arg10[%c32, %c0_17] : memref<144x256xbf16, #tpu.memory_space<vmem>>, vector<16x256xbf16>
    tpu.vector_store %arg10[%c32, %c0_17], %29 {strides = array<i32>} : memref<144x256xbf16, #tpu.memory_space<vmem>>, vector<16x256xbf16>,
    %c1_i32 = arith.constant 1 : i32
    %31 = tpu.dynamic_rotate %9 by %c1_i32 dim 1 : vector<16x256xf32>, i32 -> vector<16x256xf32>
    %c3 = arith.constant 3 : index
    %c0_18 = arith.constant 0 : index
    %c0_19 = arith.constant 0 : index
    %32 = vector.load %arg1[%c3, %c0_18, %c0_19] : memref<9x1x256xf32, #tpu.memory_space<vmem>>, vector<1x1x256xf32>
    %33 = vector.shape_cast %32 : vector<1x1x256xf32> to vector<1x256xf32>
    %34 = vector.broadcast %33 : vector<1x256xf32> to vector<16x256xf32>
    %35 = arith.mulf %31, %34 : vector<16x256xf32>
    %36 = arith.truncf %35 : vector<16x256xf32> to vector<16x256xbf16>
    %c48 = arith.constant 48 : index
    %c0_20 = arith.constant 0 : index
    %37 = vector.load %arg10[%c48, %c0_20] : memref<144x256xbf16, #tpu.memory_space<vmem>>, vector<16x256xbf16>
    tpu.vector_store %arg10[%c48, %c0_20], %36 {strides = array<i32>} : memref<144x256xbf16, #tpu.memory_space<vmem>>, vector<16x256xbf16>,
    %38 = arith.truncf %9 : vector<16x256xf32> to vector<16x256xbf16>
    %c64 = arith.constant 64 : index
    %c0_21 = arith.constant 0 : index
    %39 = vector.load %arg10[%c64, %c0_21] : memref<144x256xbf16, #tpu.memory_space<vmem>>, vector<16x256xbf16>
    tpu.vector_store %arg10[%c64, %c0_21], %38 {strides = array<i32>} : memref<144x256xbf16, #tpu.memory_space<vmem>>, vector<16x256xbf16>,
    %c255_i32 = arith.constant 255 : i32
    %40 = tpu.dynamic_rotate %9 by %c255_i32 dim 1 : vector<16x256xf32>, i32 -> vector<16x256xf32>
    %c5 = arith.constant 5 : index
    %c0_22 = arith.constant 0 : index
    %c0_23 = arith.constant 0 : index
    %41 = vector.load %arg1[%c5, %c0_22, %c0_23] : memref<9x1x256xf32, #tpu.memory_space<vmem>>, vector<1x1x256xf32>
    %42 = vector.shape_cast %41 : vector<1x1x256xf32> to vector<1x256xf32>
    %43 = vector.broadcast %42 : vector<1x256xf32> to vector<16x256xf32>
    %44 = arith.mulf %40, %43 : vector<16x256xf32>
    %45 = arith.truncf %44 : vector<16x256xf32> to vector<16x256xbf16>
    %c80 = arith.constant 80 : index
    %c0_24 = arith.constant 0 : index
    %46 = vector.load %arg10[%c80, %c0_24] : memref<144x256xbf16, #tpu.memory_space<vmem>>, vector<16x256xbf16>
    tpu.vector_store %arg10[%c80, %c0_24], %45 {strides = array<i32>} : memref<144x256xbf16, #tpu.memory_space<vmem>>, vector<16x256xbf16>,
    %c241_i32 = arith.constant 241 : i32
    %47 = tpu.dynamic_rotate %9 by %c241_i32 dim 1 : vector<16x256xf32>, i32 -> vector<16x256xf32>
    %c6 = arith.constant 6 : index
    %c0_25 = arith.constant 0 : index
    %c0_26 = arith.constant 0 : index
    %48 = vector.load %arg1[%c6, %c0_25, %c0_26] : memref<9x1x256xf32, #tpu.memory_space<vmem>>, vector<1x1x256xf32>
    %49 = vector.shape_cast %48 : vector<1x1x256xf32> to vector<1x256xf32>
    %50 = vector.broadcast %49 : vector<1x256xf32> to vector<16x256xf32>
    %51 = arith.mulf %47, %50 : vector<16x256xf32>
    %52 = arith.truncf %51 : vector<16x256xf32> to vector<16x256xbf16>
    %c96 = arith.constant 96 : index
    %c0_27 = arith.constant 0 : index
    %53 = vector.load %arg10[%c96, %c0_27] : memref<144x256xbf16, #tpu.memory_space<vmem>>, vector<16x256xbf16>
    tpu.vector_store %arg10[%c96, %c0_27], %52 {strides = array<i32>} : memref<144x256xbf16, #tpu.memory_space<vmem>>, vector<16x256xbf16>,
    %c240_i32 = arith.constant 240 : i32
    %54 = tpu.dynamic_rotate %9 by %c240_i32 dim 1 : vector<16x256xf32>, i32 -> vector<16x256xf32>
    %c7 = arith.constant 7 : index
    %c0_28 = arith.constant 0 : index
    %c0_29 = arith.constant 0 : index
    %55 = vector.load %arg1[%c7, %c0_28, %c0_29] : memref<9x1x256xf32, #tpu.memory_space<vmem>>, vector<1x1x256xf32>
    %56 = vector.shape_cast %55 : vector<1x1x256xf32> to vector<1x256xf32>
    %57 = vector.broadcast %56 : vector<1x256xf32> to vector<16x256xf32>
    %58 = arith.mulf %54, %57 : vector<16x256xf32>
    %59 = arith.truncf %58 : vector<16x256xf32> to vector<16x256xbf16>
    %c112 = arith.constant 112 : index
    %c0_30 = arith.constant 0 : index
    %60 = vector.load %arg10[%c112, %c0_30] : memref<144x256xbf16, #tpu.memory_space<vmem>>, vector<16x256xbf16>
    tpu.vector_store %arg10[%c112, %c0_30], %59 {strides = array<i32>} : memref<144x256xbf16, #tpu.memory_space<vmem>>, vector<16x256xbf16>,
    %c239_i32 = arith.constant 239 : i32
    %61 = tpu.dynamic_rotate %9 by %c239_i32 dim 1 : vector<16x256xf32>, i32 -> vector<16x256xf32>
    %c8 = arith.constant 8 : index
    %c0_31 = arith.constant 0 : index
    %c0_32 = arith.constant 0 : index
    %62 = vector.load %arg1[%c8, %c0_31, %c0_32] : memref<9x1x256xf32, #tpu.memory_space<vmem>>, vector<1x1x256xf32>
    %63 = vector.shape_cast %62 : vector<1x1x256xf32> to vector<1x256xf32>
    %64 = vector.broadcast %63 : vector<1x256xf32> to vector<16x256xf32>
    %65 = arith.mulf %61, %64 : vector<16x256xf32>
    %66 = arith.truncf %65 : vector<16x256xf32> to vector<16x256xbf16>
    %c128 = arith.constant 128 : index
    %c0_33 = arith.constant 0 : index
    %67 = vector.load %arg10[%c128, %c0_33] : memref<144x256xbf16, #tpu.memory_space<vmem>>, vector<16x256xbf16>
    tpu.vector_store %arg10[%c128, %c0_33], %66 {strides = array<i32>} : memref<144x256xbf16, #tpu.memory_space<vmem>>, vector<16x256xbf16>,
    %c0_34 = arith.constant 0 : index
    %c0_35 = arith.constant 0 : index
    %68 = vector.load %arg5[%c0_34, %c0_35] : memref<16x144xbf16, #tpu.memory_space<vmem>>, vector<16x144xbf16>
    %c0_36 = arith.constant 0 : index
    %c0_37 = arith.constant 0 : index
    %69 = vector.load %arg10[%c0_36, %c0_37] : memref<144x256xbf16, #tpu.memory_space<vmem>>, vector<144x256xbf16>
    %cst_38 = arith.constant dense<0.000000e+00> : vector<16x256xf32>
    %70 = tpu.matmul %68, %69, %cst_38 {dimension_numbers = #tpu.dot_dimension_numbers<[1], [0], [0], [1], [0, 0, 1, 1], [], []>} : vector<16x144xbf16>, vector<144x256xbf16>, vector<16x256xf32> -> vector<16x256xf32>
    %c0_39 = arith.constant 0 : index
    %c0_40 = arith.constant 0 : index
    %71 = vector.load %arg6[%c0_39, %c0_40] : memref<16x1xf32, #tpu.memory_space<vmem>>, vector<16x1xf32>
    %72 = vector.broadcast %71 : vector<16x1xf32> to vector<16x256xf32>
    %73 = arith.addf %70, %72 : vector<16x256xf32>
    %cst_41 = arith.constant 0.000000e+00 : f32
    %74 = vector.broadcast %cst_41 : f32 to vector<16x256xf32>
    %75 = arith.maximumf %73, %74 : vector<16x256xf32>
    %c0_42 = arith.constant 0 : index
    %c0_43 = arith.constant 0 : index
    %76 = vector.load %arg7[%c0_42, %c0_43] : memref<16x16xbf16, #tpu.memory_space<vmem>>, vector<16x16xbf16>
    %77 = arith.truncf %75 : vector<16x256xf32> to vector<16x256xbf16>
    %cst_44 = arith.constant dense<0.000000e+00> : vector<16x256xf32>
    %78 = tpu.matmul %76, %77, %cst_44 {dimension_numbers = #tpu.dot_dimension_numbers<[1], [0], [0], [1], [0, 0, 1, 1], [], []>} : vector<16x16xbf16>, vector<16x256xbf16>, vector<16x256xf32> -> vector<16x256xf32>
    %c0_45 = arith.constant 0 : index
    %c0_46 = arith.constant 0 : index
    %79 = vector.load %arg8[%c0_45, %c0_46] : memref<16x1xf32, #tpu.memory_space<vmem>>, vector<16x1xf32>
    %80 = vector.broadcast %79 : vector<16x1xf32> to vector<16x256xf32>
    %81 = arith.addf %78, %80 : vector<16x256xf32>
    %cst_47 = arith.constant 0.000000e+00 : f32
    %82 = vector.broadcast %cst_47 : f32 to vector<16x256xf32>
    %83 = arith.maximumf %81, %82 : vector<16x256xf32>
    %c0_48 = arith.constant 0 : index
    %c0_49 = arith.constant 0 : index
    %c0_50 = arith.constant 0 : index
    %84 = vector.load %arg2[%c0_48, %c0_49, %c0_50] : memref<1x16x256xf32, #tpu.memory_space<vmem>>, vector<1x16x256xf32>
    %85 = vector.shape_cast %84 : vector<1x16x256xf32> to vector<16x256xf32>
    %86 = arith.addf %83, %85 : vector<16x256xf32>
    %cst_51 = arith.constant 0.000000e+00 : f32
    %87 = vector.broadcast %cst_51 : f32 to vector<16x256xf32>
    %88 = arith.maximumf %86, %87 : vector<16x256xf32>
    %c0_52 = arith.constant 0 : index
    %c0_53 = arith.constant 0 : index
    %c0_54 = arith.constant 0 : index
    %89 = vector.load %arg9[%c0_52, %c0_53, %c0_54] : memref<1x16x256xf32, #tpu.memory_space<vmem>>, vector<1x16x256xf32>
    %90 = vector.shape_cast %89 : vector<1x16x256xf32> to vector<16x256xf32>
    %91 = vector.shape_cast %88 : vector<16x256xf32> to vector<1x16x256xf32>
    tpu.vector_store %arg9[%c0_52, %c0_53, %c0_54], %91 {strides = array<i32>} : memref<1x16x256xf32, #tpu.memory_space<vmem>>, vector<1x16x256xf32>,
    return
  }
  func.func @transform_0(%arg0: i32) -> (i32, i32, i32) {
    %c0_i32 = arith.constant 0 : i32
    %c0_i32_0 = arith.constant 0 : i32
    %c0_i32_1 = arith.constant 0 : i32
    %c0_i32_2 = arith.constant 0 : i32
    return %c0_i32, %c0_i32_0, %c0_i32_1 : i32, i32, i32
  }
  func.func @transform_1(%arg0: i32) -> (i32, i32, i32) {
    %c0_i32 = arith.constant 0 : i32
    %c0_i32_0 = arith.constant 0 : i32
    %c0_i32_1 = arith.constant 0 : i32
    return %arg0, %c0_i32, %c0_i32_0 : i32, i32, i32
  }
  func.func @transform_2(%arg0: i32) -> (i32, i32) {
    %c0_i32 = arith.constant 0 : i32
    %c0_i32_0 = arith.constant 0 : i32
    %c0_i32_1 = arith.constant 0 : i32
    return %c0_i32, %c0_i32_0 : i32, i32
  }
  func.func @transform_3(%arg0: i32) -> (i32, i32) {
    %c0_i32 = arith.constant 0 : i32
    %c0_i32_0 = arith.constant 0 : i32
    %c0_i32_1 = arith.constant 0 : i32
    return %c0_i32, %c0_i32_0 : i32, i32
  }
  func.func @transform_4(%arg0: i32) -> (i32, i32) {
    %c0_i32 = arith.constant 0 : i32
    %c0_i32_0 = arith.constant 0 : i32
    %c0_i32_1 = arith.constant 0 : i32
    return %c0_i32, %c0_i32_0 : i32, i32
  }
  func.func @transform_5(%arg0: i32) -> (i32, i32) {
    %c0_i32 = arith.constant 0 : i32
    %c0_i32_0 = arith.constant 0 : i32
    %c0_i32_1 = arith.constant 0 : i32
    return %c0_i32, %c0_i32_0 : i32, i32
  }
  func.func @transform_6(%arg0: i32) -> (i32, i32) {
    %c0_i32 = arith.constant 0 : i32
    %c0_i32_0 = arith.constant 0 : i32
    %c0_i32_1 = arith.constant 0 : i32
    return %c0_i32, %c0_i32_0 : i32, i32
  }
  func.func @transform_7(%arg0: i32) -> (i32, i32) {
    %c0_i32 = arith.constant 0 : i32
    %c0_i32_0 = arith.constant 0 : i32
    %c0_i32_1 = arith.constant 0 : i32
    return %c0_i32, %c0_i32_0 : i32, i32
  }
  func.func @transform_8(%arg0: i32) -> (i32, i32, i32) {
    %c0_i32 = arith.constant 0 : i32
    %c0_i32_0 = arith.constant 0 : i32
    %c0_i32_1 = arith.constant 0 : i32
    return %arg0, %c0_i32, %c0_i32_0 : i32, i32, i32
  }
}

module attributes {stable_mosaic.version = 11 : i64} {
  func.func @_bottleneck_kernel(%arg0: i32, %arg1: memref<9x1x256xf32, #tpu.memory_space<vmem>>, %arg2: memref<1x16x256xf32, #tpu.memory_space<vmem>>, %arg3: memref<16x16xbf16, #tpu.memory_space<vmem>>, %arg4: memref<16x1xf32, #tpu.memory_space<vmem>>, %arg5: memref<16x144xbf16, #tpu.memory_space<vmem>>, %arg6: memref<16x1xf32, #tpu.memory_space<vmem>>, %arg7: memref<16x16xbf16, #tpu.memory_space<vmem>>, %arg8: memref<16x1xf32, #tpu.memory_space<vmem>>, %arg9: memref<1x16x256xf32, #tpu.memory_space<vmem>>, %arg10: memref<144x256xbf16, #tpu.memory_space<vmem>>) attributes {dimension_semantics = [#tpu.dimension_semantics<parallel>], iteration_bounds = array<i64: 2>, scalar_prefetch = 0 : i64, scratch_operands = 1 : i64, tpu.core_type = #tpu.core_type<tc>, window_params = [{pipeline_mode = #tpu.pipeline_mode<synchronous>, transform_indices = @transform_0, window_bounds = array<i64: 9, 1, 256>}, {transform_indices = @transform_1, window_bounds = array<i64: 1, 16, 256>}, {pipeline_mode = #tpu.pipeline_mode<synchronous>, transform_indices = @transform_2, window_bounds = array<i64: 16, 16>}, {pipeline_mode = #tpu.pipeline_mode<synchronous>, transform_indices = @transform_3, window_bounds = array<i64: 16, 1>}, {pipeline_mode = #tpu.pipeline_mode<synchronous>, transform_indices = @transform_4, window_bounds = array<i64: 16, 144>}, {pipeline_mode = #tpu.pipeline_mode<synchronous>, transform_indices = @transform_5, window_bounds = array<i64: 16, 1>}, {pipeline_mode = #tpu.pipeline_mode<synchronous>, transform_indices = @transform_6, window_bounds = array<i64: 16, 16>}, {pipeline_mode = #tpu.pipeline_mode<synchronous>, transform_indices = @transform_7, window_bounds = array<i64: 16, 1>}, {transform_indices = @transform_8, window_bounds = array<i64: 1, 16, 256>}]} {
    %c0 = arith.constant 0 : index
    %c0_0 = arith.constant 0 : index
    %c0_1 = arith.constant 0 : index
    %0 = vector.load %arg2[%c0, %c0_0, %c0_1] : memref<1x16x256xf32, #tpu.memory_space<vmem>>, vector<1x16x256xf32>
    %1 = vector.shape_cast %0 : vector<1x16x256xf32> to vector<16x256xf32>
    %2 = arith.truncf %1 : vector<16x256xf32> to vector<16x256xbf16>
    %c0_2 = arith.constant 0 : index
    %c0_3 = arith.constant 0 : index
    %3 = vector.load %arg3[%c0_2, %c0_3] : memref<16x16xbf16, #tpu.memory_space<vmem>>, vector<16x16xbf16>
    %cst = arith.constant dense<0.000000e+00> : vector<16x256xf32>
    %4 = tpu.matmul %3, %2, %cst {dimension_numbers = #tpu.dot_dimension_numbers<[1], [0], [0], [1], [0, 0, 1, 1], [], []>} : vector<16x16xbf16>, vector<16x256xbf16>, vector<16x256xf32> -> vector<16x256xf32>
    %c0_4 = arith.constant 0 : index
    %c0_5 = arith.constant 0 : index
    %5 = vector.load %arg4[%c0_4, %c0_5] : memref<16x1xf32, #tpu.memory_space<vmem>>, vector<16x1xf32>
    %6 = vector.broadcast %5 : vector<16x1xf32> to vector<16x256xf32>
    %7 = arith.addf %4, %6 : vector<16x256xf32>
    %cst_6 = arith.constant 0.000000e+00 : f32
    %8 = vector.broadcast %cst_6 : f32 to vector<16x256xf32>
    %9 = arith.maximumf %7, %8 : vector<16x256xf32>
    %c17_i32 = arith.constant 17 : i32
    %10 = tpu.dynamic_rotate %9 by %c17_i32 dim 1 : vector<16x256xf32>, i32 -> vector<16x256xf32>
    %c0_7 = arith.constant 0 : index
    %c0_8 = arith.constant 0 : index
    %c0_9 = arith.constant 0 : index
    %11 = vector.load %arg1[%c0_7, %c0_8, %c0_9] : memref<9x1x256xf32, #tpu.memory_space<vmem>>, vector<1x1x256xf32>
    %12 = vector.shape_cast %11 : vector<1x1x256xf32> to vector<1x256xf32>
    %13 = vector.broadcast %12 : vector<1x256xf32> to vector<16x256xf32>
    %14 = arith.mulf %10, %13 : vector<16x256xf32>
    %15 = arith.truncf %14 : vector<16x256xf32> to vector<16x256xbf16>
    %c0_10 = arith.constant 0 : index
    %c0_11 = arith.constant 0 : index
    %16 = vector.load %arg10[%c0_10, %c0_11] : memref<144x256xbf16, #tpu.memory_space<vmem>>, vector<16x256xbf16>
    tpu.vector_store %arg10[%c0_10, %c0_11], %15 {strides = array<i32>} : memref<144x256xbf16, #tpu.memory_space<vmem>>, vector<16x256xbf16>,
    %c16_i32 = arith.constant 16 : i32
    %17 = tpu.dynamic_rotate %9 by %c16_i32 dim 1 : vector<16x256xf32>, i32 -> vector<16x256xf32>
    %c1 = arith.constant 1 : index
    %c0_12 = arith.constant 0 : index
    %c0_13 = arith.constant 0 : index
    %18 = vector.load %arg1[%c1, %c0_12, %c0_13] : memref<9x1x256xf32, #tpu.memory_space<vmem>>, vector<1x1x256xf32>
    %19 = vector.shape_cast %18 : vector<1x1x256xf32> to vector<1x256xf32>
    %20 = vector.broadcast %19 : vector<1x256xf32> to vector<16x256xf32>
    %21 = arith.mulf %17, %20 : vector<16x256xf32>
    %22 = arith.truncf %21 : vector<16x256xf32> to vector<16x256xbf16>
    %c16 = arith.constant 16 : index
    %c0_14 = arith.constant 0 : index
    %23 = vector.load %arg10[%c16, %c0_14] : memref<144x256xbf16, #tpu.memory_space<vmem>>, vector<16x256xbf16>
    tpu.vector_store %arg10[%c16, %c0_14], %22 {strides = array<i32>} : memref<144x256xbf16, #tpu.memory_space<vmem>>, vector<16x256xbf16>,
    %c15_i32 = arith.constant 15 : i32
    %24 = tpu.dynamic_rotate %9 by %c15_i32 dim 1 : vector<16x256xf32>, i32 -> vector<16x256xf32>
    %c2 = arith.constant 2 : index
    %c0_15 = arith.constant 0 : index
    %c0_16 = arith.constant 0 : index
    %25 = vector.load %arg1[%c2, %c0_15, %c0_16] : memref<9x1x256xf32, #tpu.memory_space<vmem>>, vector<1x1x256xf32>
    %26 = vector.shape_cast %25 : vector<1x1x256xf32> to vector<1x256xf32>
    %27 = vector.broadcast %26 : vector<1x256xf32> to vector<16x256xf32>
    %28 = arith.mulf %24, %27 : vector<16x256xf32>
    %29 = arith.truncf %28 : vector<16x256xf32> to vector<16x256xbf16>
    %c32 = arith.constant 32 : index
    %c0_17 = arith.constant 0 : index
    %30 = vector.load %arg10[%c32, %c0_17] : memref<144x256xbf16, #tpu.memory_space<vmem>>, vector<16x256xbf16>
    tpu.vector_store %arg10[%c32, %c0_17], %29 {strides = array<i32>} : memref<144x256xbf16, #tpu.memory_space<vmem>>, vector<16x256xbf16>,
    %c1_i32 = arith.constant 1 : i32
    %31 = tpu.dynamic_rotate %9 by %c1_i32 dim 1 : vector<16x256xf32>, i32 -> vector<16x256xf32>
    %c3 = arith.constant 3 : index
    %c0_18 = arith.constant 0 : index
    %c0_19 = arith.constant 0 : index
    %32 = vector.load %arg1[%c3, %c0_18, %c0_19] : memref<9x1x256xf32, #tpu.memory_space<vmem>>, vector<1x1x256xf32>
    %33 = vector.shape_cast %32 : vector<1x1x256xf32> to vector<1x256xf32>
    %34 = vector.broadcast %33 : vector<1x256xf32> to vector<16x256xf32>
    %35 = arith.mulf %31, %34 : vector<16x256xf32>
    %36 = arith.truncf %35 : vector<16x256xf32> to vector<16x256xbf16>
    %c48 = arith.constant 48 : index
    %c0_20 = arith.constant 0 : index
    %37 = vector.load %arg10[%c48, %c0_20] : memref<144x256xbf16, #tpu.memory_space<vmem>>, vector<16x256xbf16>
    tpu.vector_store %arg10[%c48, %c0_20], %36 {strides = array<i32>} : memref<144x256xbf16, #tpu.memory_space<vmem>>, vector<16x256xbf16>,
    %38 = arith.truncf %9 : vector<16x256xf32> to vector<16x256xbf16>
    %c64 = arith.constant 64 : index
    %c0_21 = arith.constant 0 : index
    %39 = vector.load %arg10[%c64, %c0_21] : memref<144x256xbf16, #tpu.memory_space<vmem>>, vector<16x256xbf16>
    tpu.vector_store %arg10[%c64, %c0_21], %38 {strides = array<i32>} : memref<144x256xbf16, #tpu.memory_space<vmem>>, vector<16x256xbf16>,
    %c255_i32 = arith.constant 255 : i32
    %40 = tpu.dynamic_rotate %9 by %c255_i32 dim 1 : vector<16x256xf32>, i32 -> vector<16x256xf32>
    %c5 = arith.constant 5 : index
    %c0_22 = arith.constant 0 : index
    %c0_23 = arith.constant 0 : index
    %41 = vector.load %arg1[%c5, %c0_22, %c0_23] : memref<9x1x256xf32, #tpu.memory_space<vmem>>, vector<1x1x256xf32>
    %42 = vector.shape_cast %41 : vector<1x1x256xf32> to vector<1x256xf32>
    %43 = vector.broadcast %42 : vector<1x256xf32> to vector<16x256xf32>
    %44 = arith.mulf %40, %43 : vector<16x256xf32>
    %45 = arith.truncf %44 : vector<16x256xf32> to vector<16x256xbf16>
    %c80 = arith.constant 80 : index
    %c0_24 = arith.constant 0 : index
    %46 = vector.load %arg10[%c80, %c0_24] : memref<144x256xbf16, #tpu.memory_space<vmem>>, vector<16x256xbf16>
    tpu.vector_store %arg10[%c80, %c0_24], %45 {strides = array<i32>} : memref<144x256xbf16, #tpu.memory_space<vmem>>, vector<16x256xbf16>,
    %c241_i32 = arith.constant 241 : i32
    %47 = tpu.dynamic_rotate %9 by %c241_i32 dim 1 : vector<16x256xf32>, i32 -> vector<16x256xf32>
    %c6 = arith.constant 6 : index
    %c0_25 = arith.constant 0 : index
    %c0_26 = arith.constant 0 : index
    %48 = vector.load %arg1[%c6, %c0_25, %c0_26] : memref<9x1x256xf32, #tpu.memory_space<vmem>>, vector<1x1x256xf32>
    %49 = vector.shape_cast %48 : vector<1x1x256xf32> to vector<1x256xf32>
    %50 = vector.broadcast %49 : vector<1x256xf32> to vector<16x256xf32>
    %51 = arith.mulf %47, %50 : vector<16x256xf32>
    %52 = arith.truncf %51 : vector<16x256xf32> to vector<16x256xbf16>
    %c96 = arith.constant 96 : index
    %c0_27 = arith.constant 0 : index
    %53 = vector.load %arg10[%c96, %c0_27] : memref<144x256xbf16, #tpu.memory_space<vmem>>, vector<16x256xbf16>
    tpu.vector_store %arg10[%c96, %c0_27], %52 {strides = array<i32>} : memref<144x256xbf16, #tpu.memory_space<vmem>>, vector<16x256xbf16>,
    %c240_i32 = arith.constant 240 : i32
    %54 = tpu.dynamic_rotate %9 by %c240_i32 dim 1 : vector<16x256xf32>, i32 -> vector<16x256xf32>
    %c7 = arith.constant 7 : index
    %c0_28 = arith.constant 0 : index
    %c0_29 = arith.constant 0 : index
    %55 = vector.load %arg1[%c7, %c0_28, %c0_29] : memref<9x1x256xf32, #tpu.memory_space<vmem>>, vector<1x1x256xf32>
    %56 = vector.shape_cast %55 : vector<1x1x256xf32> to vector<1x256xf32>
    %57 = vector.broadcast %56 : vector<1x256xf32> to vector<16x256xf32>
    %58 = arith.mulf %54, %57 : vector<16x256xf32>
    %59 = arith.truncf %58 : vector<16x256xf32> to vector<16x256xbf16>
    %c112 = arith.constant 112 : index
    %c0_30 = arith.constant 0 : index
    %60 = vector.load %arg10[%c112, %c0_30] : memref<144x256xbf16, #tpu.memory_space<vmem>>, vector<16x256xbf16>
    tpu.vector_store %arg10[%c112, %c0_30], %59 {strides = array<i32>} : memref<144x256xbf16, #tpu.memory_space<vmem>>, vector<16x256xbf16>,
    %c239_i32 = arith.constant 239 : i32
    %61 = tpu.dynamic_rotate %9 by %c239_i32 dim 1 : vector<16x256xf32>, i32 -> vector<16x256xf32>
    %c8 = arith.constant 8 : index
    %c0_31 = arith.constant 0 : index
    %c0_32 = arith.constant 0 : index
    %62 = vector.load %arg1[%c8, %c0_31, %c0_32] : memref<9x1x256xf32, #tpu.memory_space<vmem>>, vector<1x1x256xf32>
    %63 = vector.shape_cast %62 : vector<1x1x256xf32> to vector<1x256xf32>
    %64 = vector.broadcast %63 : vector<1x256xf32> to vector<16x256xf32>
    %65 = arith.mulf %61, %64 : vector<16x256xf32>
    %66 = arith.truncf %65 : vector<16x256xf32> to vector<16x256xbf16>
    %c128 = arith.constant 128 : index
    %c0_33 = arith.constant 0 : index
    %67 = vector.load %arg10[%c128, %c0_33] : memref<144x256xbf16, #tpu.memory_space<vmem>>, vector<16x256xbf16>
    tpu.vector_store %arg10[%c128, %c0_33], %66 {strides = array<i32>} : memref<144x256xbf16, #tpu.memory_space<vmem>>, vector<16x256xbf16>,
    %c0_34 = arith.constant 0 : index
    %c0_35 = arith.constant 0 : index
    %68 = vector.load %arg5[%c0_34, %c0_35] : memref<16x144xbf16, #tpu.memory_space<vmem>>, vector<16x144xbf16>
    %c0_36 = arith.constant 0 : index
    %c0_37 = arith.constant 0 : index
    %69 = vector.load %arg10[%c0_36, %c0_37] : memref<144x256xbf16, #tpu.memory_space<vmem>>, vector<144x256xbf16>
    %cst_38 = arith.constant dense<0.000000e+00> : vector<16x256xf32>
    %70 = tpu.matmul %68, %69, %cst_38 {dimension_numbers = #tpu.dot_dimension_numbers<[1], [0], [0], [1], [0, 0, 1, 1], [], []>} : vector<16x144xbf16>, vector<144x256xbf16>, vector<16x256xf32> -> vector<16x256xf32>
    %c0_39 = arith.constant 0 : index
    %c0_40 = arith.constant 0 : index
    %71 = vector.load %arg6[%c0_39, %c0_40] : memref<16x1xf32, #tpu.memory_space<vmem>>, vector<16x1xf32>
    %72 = vector.broadcast %71 : vector<16x1xf32> to vector<16x256xf32>
    %73 = arith.addf %70, %72 : vector<16x256xf32>
    %cst_41 = arith.constant 0.000000e+00 : f32
    %74 = vector.broadcast %cst_41 : f32 to vector<16x256xf32>
    %75 = arith.maximumf %73, %74 : vector<16x256xf32>
    %c0_42 = arith.constant 0 : index
    %c0_43 = arith.constant 0 : index
    %76 = vector.load %arg7[%c0_42, %c0_43] : memref<16x16xbf16, #tpu.memory_space<vmem>>, vector<16x16xbf16>
    %77 = arith.truncf %75 : vector<16x256xf32> to vector<16x256xbf16>
    %cst_44 = arith.constant dense<0.000000e+00> : vector<16x256xf32>
    %78 = tpu.matmul %76, %77, %cst_44 {dimension_numbers = #tpu.dot_dimension_numbers<[1], [0], [0], [1], [0, 0, 1, 1], [], []>} : vector<16x16xbf16>, vector<16x256xbf16>, vector<16x256xf32> -> vector<16x256xf32>
    %c0_45 = arith.constant 0 : index
    %c0_46 = arith.constant 0 : index
    %79 = vector.load %arg8[%c0_45, %c0_46] : memref<16x1xf32, #tpu.memory_space<vmem>>, vector<16x1xf32>
    %80 = vector.broadcast %79 : vector<16x1xf32> to vector<16x256xf32>
    %81 = arith.addf %78, %80 : vector<16x256xf32>
    %cst_47 = arith.constant 0.000000e+00 : f32
    %82 = vector.broadcast %cst_47 : f32 to vector<16x256xf32>
    %83 = arith.maximumf %81, %82 : vector<16x256xf32>
    %c0_48 = arith.constant 0 : index
    %c0_49 = arith.constant 0 : index
    %c0_50 = arith.constant 0 : index
    %84 = vector.load %arg2[%c0_48, %c0_49, %c0_50] : memref<1x16x256xf32, #tpu.memory_space<vmem>>, vector<1x16x256xf32>
    %85 = vector.shape_cast %84 : vector<1x16x256xf32> to vector<16x256xf32>
    %86 = arith.addf %83, %85 : vector<16x256xf32>
    %cst_51 = arith.constant 0.000000e+00 : f32
    %87 = vector.broadcast %cst_51 : f32 to vector<16x256xf32>
    %88 = arith.maximumf %86, %87 : vector<16x256xf32>
    %c0_52 = arith.constant 0 : index
    %c0_53 = arith.constant 0 : index
    %c0_54 = arith.constant 0 : index
    %89 = vector.load %arg9[%c0_52, %c0_53, %c0_54] : memref<1x16x256xf32, #tpu.memory_space<vmem>>, vector<1x16x256xf32>
    %90 = vector.shape_cast %89 : vector<1x16x256xf32> to vector<16x256xf32>
    %91 = vector.shape_cast %88 : vector<16x256xf32> to vector<1x16x256xf32>
    tpu.vector_store %arg9[%c0_52, %c0_53, %c0_54], %91 {strides = array<i32>} : memref<1x16x256xf32, #tpu.memory_space<vmem>>, vector<1x16x256xf32>,
    return
  }
  func.func @transform_0(%arg0: i32) -> (i32, i32, i32) {
    %c0_i32 = arith.constant 0 : i32
    %c0_i32_0 = arith.constant 0 : i32
    %c0_i32_1 = arith.constant 0 : i32
    %c0_i32_2 = arith.constant 0 : i32
    return %c0_i32, %c0_i32_0, %c0_i32_1 : i32, i32, i32
  }
  func.func @transform_1(%arg0: i32) -> (i32, i32, i32) {
    %c0_i32 = arith.constant 0 : i32
    %c0_i32_0 = arith.constant 0 : i32
    %c0_i32_1 = arith.constant 0 : i32
    return %arg0, %c0_i32, %c0_i32_0 : i32, i32, i32
  }
  func.func @transform_2(%arg0: i32) -> (i32, i32) {
    %c0_i32 = arith.constant 0 : i32
    %c0_i32_0 = arith.constant 0 : i32
    %c0_i32_1 = arith.constant 0 : i32
    return %c0_i32, %c0_i32_0 : i32, i32
  }
  func.func @transform_3(%arg0: i32) -> (i32, i32) {
    %c0_i32 = arith.constant 0 : i32
    %c0_i32_0 = arith.constant 0 : i32
    %c0_i32_1 = arith.constant 0 : i32
    return %c0_i32, %c0_i32_0 : i32, i32
  }
  func.func @transform_4(%arg0: i32) -> (i32, i32) {
    %c0_i32 = arith.constant 0 : i32
    %c0_i32_0 = arith.constant 0 : i32
    %c0_i32_1 = arith.constant 0 : i32
    return %c0_i32, %c0_i32_0 : i32, i32
  }
  func.func @transform_5(%arg0: i32) -> (i32, i32) {
    %c0_i32 = arith.constant 0 : i32
    %c0_i32_0 = arith.constant 0 : i32
    %c0_i32_1 = arith.constant 0 : i32
    return %c0_i32, %c0_i32_0 : i32, i32
  }
  func.func @transform_6(%arg0: i32) -> (i32, i32) {
    %c0_i32 = arith.constant 0 : i32
    %c0_i32_0 = arith.constant 0 : i32
    %c0_i32_1 = arith.constant 0 : i32
    return %c0_i32, %c0_i32_0 : i32, i32
  }
  func.func @transform_7(%arg0: i32) -> (i32, i32) {
    %c0_i32 = arith.constant 0 : i32
    %c0_i32_0 = arith.constant 0 : i32
    %c0_i32_1 = arith.constant 0 : i32
    return %c0_i32, %c0_i32_0 : i32, i32
  }
  func.func @transform_8(%arg0: i32) -> (i32, i32, i32) {
    %c0_i32 = arith.constant 0 : i32
    %c0_i32_0 = arith.constant 0 : i32
    %c0_i32_1 = arith.constant 0 : i32
    return %arg0, %c0_i32, %c0_i32_0 : i32, i32, i32
  }
}

</mosaic_0001>

<bundles_post_ra>
// kernel: tpu_custom_call.1
= control target key start
LH: loop header
LB: loop body
LE: loop exit
PB: predicated region body
PF: predicated region fallthrough
CT: control target
= control target key end

     0   :  { %13 = vsyncpa [#allocation4], 0  ;;  %s1859_s0 = inlined_call_operand.vmem [shape: f32[9,1,256], index: 0, kind: input, shape index: {}]   ;;  %s1860_s1 = inlined_call_operand.hbm [shape: f32[2,16,256], index: 1, kind: input, shape index: {}]   ;;  %s1861_s2 = inlined_call_operand.vmem [shape: bf16[16,16], index: 2, kind: input, shape index: {}]   ;;  %s1862_s3 = inlined_call_operand.vmem [shape: f32[16,1], index: 3, kind: input, shape index: {}]   ;;  %s1863_s4 = inlined_call_operand.vmem [shape: bf16[16,144], index: 4, kind: input, shape index: {}]   ;;  %s1864_s5 = inlined_call_operand.vmem [shape: f32[16,1], index: 5, kind: input, shape index: {}]   ;;  %s1865_s6 = inlined_call_operand.vmem [shape: bf16[16,16], index: 6, kind: input, shape index: {}]   ;;  %s1866_s7 = inlined_call_operand.vmem [shape: f32[16,1], index: 7, kind: input, shape index: {}]   ;;  %s1867_s8 = inlined_call_operand.hbm [shape: f32[2,16,256], index: 8, kind: output, shape index: {}]  }
   0x1   :  { %15 = vsyncpa [#allocation4 + $0x1], 0 }
   0x2   :  { %16 = vsyncpa [#allocation5], 0 }
   0x3   :  { %18 = vsyncpa [#allocation5 + $0x1], 0  ;;  %s1443_s27 = smov 0   ;;  %s1445_s28 = smov 0  }
   0x4   :  { %s1447_s29 = smov 0   ;;  %s1449_s30 = smov 0  }
   0x5 LB: > { %s1464_s9 = sadd.s32 4294967295, %s1382_s30   ;;  %s1123_s10 = sadd.s32 4294967294, %s1382_s30   ;;  %s1382_s30 = sphi %s1449_s30, %s1884_s30   ;;  %s1378_s29 = sphi %s1447_s29, %s1883_s29   ;;  %s1374_s28 = sphi %s1445_s28, %s1882_s28   ;;  %s1370_s27 = sphi %s1443_s27, %s1881_s27  }
   0x6   : > { %s1468_s11 = sadd.s32 1, %s1382_s30   ;;  %s52_s12 = sadd.s32 1, %s1378_s29 }
   0x7   : > { %s49_s13 = ssub.s32 %s1382_s30, %s1468_s11  ;;  %p59_p0 = scmp.ne.s32.totalorder %s1378_s29, %s1374_s28 }
   0x8   : > { %p50_p1 = scmp.eq.s32.totalorder %s49_s13, 0  ;;  %p60_p2 = scmp.eq.s32.totalorder %s1382_s30, 0 }
   0x9   : > { %p65_p3 = scmp.ne.s32.totalorder %s1374_s28, %s1370_s27  ;;  %p66_p4 = scmp.eq.s32.totalorder %s1464_s9, 0 }
   0xa   : > { %s1480_s14 = scalar_select %p50_p1, %s1378_s29, %s52_s12  }
   0xb   : > { %p1482_p5 = por %p60_p2, %p59_p0  ;;  %p1486_p6 = por %p66_p4, %p65_p3 }
   0xc   : > { %1870 = sst [smem:[#allocation9_spill]] %s1480_s14  ;;  %p215_p7 = scmp.eq.s32.totalorder %s1464_s9, 1 }
   0xd   : > { %s1872_s16 = scalar_select %p1486_p6, 1, 0 }
   0xe   : > { %p221_p8 = scmp.eq.s32.totalorder %s1123_s10, 1  ;;  %p1237_p10 = scmp.lt.s32.totalorder %s1382_s30, 2 }
   0xf   : > { %p1493_p11 = por %p215_p7, %p59_p0  ;;  %s262_s19 = sand.u32 1, %s1378_s29  }
  0x10   : > { %p1497_p12 = por %p221_p8, %p65_p3  ;;  %s1187_s20 = sshll.u32 %s1382_s30, 9 }
  0x11   : > { %s1873_s17 = scalar_select %p1493_p11, 1, 0 }
  0x12   : > { %s1874_s18 = scalar_select %p1497_p12, 1, 0 }
  0x13   : > { %s1126_s21 = sshll.u32 %s262_s19, 5  ;;  %s1506_s24 = scalar_lea.hbm %s1860_s1, %s1187_s20 }
  0x14   : > { %s266_s25 = scalar_lea.vmem [#allocation3], %s1126_s21  ;;  %p1510_p13 = pnand %p1237_p10, %p1482_p5 }
  0x15   : > { %s273_s26 = sshll.u32 %s266_s25, 4  ;;  %s1516_s12 = scalar_lea.sflag [#allocation4], %s262_s19  ;;  %s1514_s26 = int_to_ptr.vmem [resolvable:$true] %s273_s26 }
  0x16   : > { %s1290_s13 = scalar_lea.hbm %s1506_s24, 512  ;;  %p1292_p1 = pneg %p1510_p13 }
  0x17   : > { %p1291_p0 = scmp.ne.s32.totalorder %s1506_s24, %s1290_s13  ;;  %s1295_s21 = scalar_lea.hbm %s1860_s1, 1024 }
  0x18   : > { %p1296_p4 = scmp.lt.s32.totalorder %s1506_s24, %s1860_s1  ;;  %p1297_p5 = scmp.lt.s32.totalorder %s1295_s21, %s1290_s13 }
  0x19   : > { %p1293_p2 = pnand %p1292_p1, %p1291_p0 }
  0x1a   : > { %p1298_p7 = por %p1297_p5, %p1296_p4 }
  0x1b   : > { %p1294_p3 = pneg %p1293_p2 }
  0x1d   : > { %p1299_p8 = pnand %p1298_p7, %p1294_p3 }
  0x1f   : > { %1302 = shalt.err (!%p1299_p8)
}
  0x20   : > { %s1303_s19 = scalar_lea.vmem %s1514_s26, 512  ;;  %s1384_s25 = smov [#allocation3]  }
  0x21   : > { %p1304_p10 = scmp.ne.s32.totalorder %s1514_s26, %s1303_s19  ;;  %s1308_s14 = sshll.u32 %s1384_s25, 4  ;;  %s1309_s14 = int_to_ptr.vmem [resolvable:$false] %s1308_s14 }
  0x22   : > { %s1310_s20 = scalar_lea.vmem %s1309_s14, 1024  ;;  %p1311_p2 = scmp.lt.s32.totalorder %s1514_s26, %s1309_s14 }
  0x23   : > { %p1306_p9 = pnand %p1304_p10, %p1292_p1  ;;  %p1312_p12 = scmp.lt.s32.totalorder %s1310_s20, %s1303_s19 }
  0x25   : > { %p1307_p0 = pneg %p1306_p9  ;;  %p1313_p11 = por %p1312_p12, %p1311_p2 }
  0x27   : > { %p1314_p6 = pnand %p1313_p11, %p1307_p0 }
  0x29   : > { %1317 = shalt.err (!%p1314_p6)
}
  0x2a   : > { %s1385_s13 = smov 256   ;;  %s1386_s22 = smov 16  }
  0x2b   : > { %1232 = dma.hbm_to_vmem [thread:$0]  (!%p1510_p13), %s1506_s24, 512, %s1514_s26, %s1516_s12, %s1385_s13, %s1385_s13, %s1386_s22  }
  0x2c   : > { %p1129_p9 = scmp.ge.s32.totalorder %s1382_s30, 1  ;;  %p281_p1 = scmp.lt.s32.totalorder %s1382_s30, 3 }
  0x2e   : > { %p282_p3 = pnand %p1129_p9, %p281_p1 }
  0x2f   : > { %s1540_s14 = sand.u32 (!%p282_p3), 1, %s1374_s28   ;;  %p1876_p6 = scmp.ne.s32.totalorder (!%p282_p3), %s1872_s16, 0 }
  0x30   : > { %285 = sbr.rel (%p282_p3) target bundleno = 876 (0x36c), region = 52  ;;  %s1130_s21 = sshll.u32 (!%p282_p3), %s1540_s14, 5 }
  0x31   : > { %s288_s15 = scalar_lea.sflag (!%p282_p3), [#allocation4], %s1540_s14  ;;  %s291_s23 = scalar_lea.vmem (!%p282_p3), [#allocation3], %s1130_s21 }
  0x35   : > { %1361 = dma.done.wait (%p1876_p6), %s288_s15, 512  }
  0x36   : > { %1363 = vsyncadd (%p1876_p6), %s288_s15, 4294966784  ;;  %v1387_v0 = vmov 0   ;;  %v1550_v1 = vld [vmem:[%s291_s23 + $0x8] sm:$0xff]  ;;  %v1552_v2 = vld [vmem:[%s291_s23 + $0x18] sm:$0xff]  ;;  %vm350_vm0 = vcmask 130048   ;;  %s1388_s25 = smov 113   ;;  %v409_v41 = vlaneseq }
  0x37   : > { %386 = vmatprep.mubr.bf16.mxu0 %v1387_v0  ;;  %1283 = vset.pattern.permute.xlu0 %v1387_v0  ;;  %v1554_v3 = vld [vmem:[%s291_s23] sm:$0xff]  ;;  %v330_v4 = vpack.c.bf16 %v1552_v2, %v1550_v1  ;;  %v1558_v5 = vld [vmem:[%s291_s23 + $0x10] sm:$0xff]  ;;  %v334_v9 = vld [vmem:[%s1862_s3 + $0x8] sm:$0xff]  ;;  %s1389_s20 = smov 112   ;;  %s1390_s13 = smov 127  }
  0x38   : > { %1284 = vset.pattern.permute.xlu1 %v1387_v0  ;;  %v329_v6 = vpack.c.bf16 %v1558_v5, %v1554_v3  ;;  %v1285_v7 = vld [vmem:[%s1861_s2] sm:$0xff]   ;;  %s1391_s22 = smov 1   ;;  %s1392_s15 = smov 15   ;;  %v789_v29 = vld [vmem:[%s1864_s5 + $0x8] sm:$0xff]  ;;  %v419_v44 = vshrl.u32 %v409_v41, 7  ;;  %v1652_v45 = vand.u32 127, %v409_v41 }
  0x39   : > { %v333_v8 = vld [vmem:[%s1862_s3] sm:$0xff]  ;;  %368 = vmatprep.subr.bf16.mxu0 %v330_v4  ;;  %s1393_s23 = smov 16   ;;  %s1394_s16 = smov 17   ;;  %v954_v30 = vld [vmem:[%s1866_s7 + $0x8] sm:$0xff] }
  0x3a   : > { %337 = vperm.xlu0 %1283, %v333_v8   ;;  %369 = vmatpush1.bf16.msra.mxu0 %v329_v6  ;;  %s1395_s24 = smov 111   ;;  %v788_v26 = vld [vmem:[%s1864_s5] sm:$0xff]  ;;  %v1656_v48 = vsub.s32 0, %v419_v44  ;;  %v1658_v49 = vsub.s32 1, %v419_v44  ;;  %v1153_v50 = vld [vmem:[%s1859_s0 + $0xe] sm:$0x3] }
  0x3b   : > { %v1288_v27 = vld [vmem:[%s1863_s4 + $0x4] ss:$8 sps:$4 sm:$0xff]   ;;  %vm688_vm1 = vcmp.lt.s32.totalorder %v1652_v45, 112  ;;  %vm644_vm2 = vcmp.lt.s32.totalorder %v1652_v45, 113  ;;  %v1147_v4 = vld [vmem:[%s1859_s0 + $0xa] sm:$0x3] }
  0x3c   : > { %1179 = vmatprep.mubr.msk.bf16.mxu1 %vm350_vm0, %v1288_v27  ;;  %v953_v28 = vld [vmem:[%s1866_s7] sm:$0xff]  ;;  %v699_v53 = vrot.slane %v1153_v50, %v1656_v48  ;;  %v1150_v54 = vld [vmem:[%s1859_s0 + $0xc] sm:$0x3]  ;;  %v703_v55 = vrot.slane %v1153_v50, %v1658_v49  ;;  %vm600_vm3 = vcmp.lt.s32.totalorder %v1652_v45, 127  ;;  %vm542_vm4 = vcmp.lt.s32.totalorder %v1652_v45, 1  ;;  %s1037_s12 = scalar_lea.sflag [#allocation5], %s1540_s14 }
  0x3d   : > { %1133 = vmatmul.mubr.msk.bf16.vlgmr.msra.gmra.mxu0 %vm350_vm0, %v1285_v7  ;;  %v655_v60 = vrot.slane %v1150_v54, %v1656_v48  ;;  %v659_v61 = vrot.slane %v1150_v54, %v1658_v49  ;;  %vm498_vm5 = vcmp.lt.s32.totalorder %v1652_v45, 15  ;;  %vm454_vm6 = vcmp.lt.s32.totalorder %v1652_v45, 16  ;;  %p1877_p12 = scmp.ne.s32.totalorder %s1873_s17, 0 }
  0x3e   : > { %342 = vperm.xlu0 %1283, %v334_v9   ;;  %1005 = vmatprep.mubr.bf16.mxu0 %v1387_v0  ;;  %vm411_vm7 = vcmp.lt.s32.totalorder %v1652_v45, 17  ;;  %vm732_vm8 = vcmp.lt.s32.totalorder %v1652_v45, 111 }
  0xb5   : > { %v338_v10 = vpop.permute.xlu0 %337 }
  0xb9   : > { %v343_v15 = vpop.permute.xlu0 %342 }
  0xfd   : > { %v388_v11 = vpop.f32.mrf.mxu0 }
  0xfe   : > { %v389_v12 = vadd.f32 %v388_v11, %v338_v10 }
  0xff   : > { %v390_v13 = vpop.f32.mrf.mxu0 }
 0x100   : > { %v1572_v14 = vmax.f32 %v389_v12, 0.0  ;;  %v391_v17 = vadd.f32 %v390_v13, %v338_v10 }
 0x101   : > { %v392_v16 = vpop.f32.mrf.mxu0 }
 0x102   : > { %v393_v18 = vadd.f32 %v392_v16, %v343_v15  ;;  %636 = vrot.lane.b32.xlu0 %v1572_v14, %s1388_s25  ;;  %680 = vrot.lane.b32.xlu1 %v1572_v14, %s1389_s20  ;;  %v1579_v22 = vmax.f32 %v391_v17, 0.0  ;;  %v611_v16 = vrot.slane %v1147_v4, %v1656_v48  ;;  %v615_v17 = vrot.slane %v1147_v4, %v1658_v49 }
 0x103   : > { %v394_v19 = vpop.f32.mrf.mxu0 }
 0x104   : > { %v1577_v20 = vmax.f32 %v393_v18, 0.0  ;;  %v395_v21 = vadd.f32 %v394_v19, %v343_v15 }
 0x106   : > { %v1581_v23 = vmax.f32 %v395_v21, 0.0  ;;  %592 = vrot.lane.b32.xlu0 %v1572_v14, %s1390_s13  ;;  %682 = vrot.lane.b32.xlu1 %v1577_v20, %s1389_s20  ;;  %v1215_v24 = vpack.c.bf16 %v1577_v20, %v1572_v14 }
 0x108   : > { %v1216_v25 = vpack.c.bf16 %v1581_v23, %v1579_v22 }
 0x10a   : > { %534 = vrot.lane.b32.xlu0 %v1572_v14, %s1391_s22  ;;  %638 = vrot.lane.b32.xlu1 %v1577_v20, %s1388_s25 }
 0x10e   : > { %490 = vrot.lane.b32.xlu0 %v1572_v14, %s1392_s15  ;;  %594 = vrot.lane.b32.xlu1 %v1577_v20, %s1390_s13 }
 0x112   : > { %446 = vrot.lane.b32.xlu0 %v1572_v14, %s1393_s23  ;;  %536 = vrot.lane.b32.xlu1 %v1577_v20, %s1391_s22 }
 0x116   : > { %401 = vrot.lane.b32.xlu0 %v1572_v14, %s1394_s16  ;;  %492 = vrot.lane.b32.xlu1 %v1577_v20, %s1392_s15 }
 0x11a   : > { %684 = vrot.lane.b32.xlu0 %v1579_v22, %s1389_s20  ;;  %448 = vrot.lane.b32.xlu1 %v1577_v20, %s1393_s23 }
 0x11e   : > { %640 = vrot.lane.b32.xlu0 %v1579_v22, %s1388_s25  ;;  %403 = vrot.lane.b32.xlu1 %v1577_v20, %s1394_s16 }
 0x122   : > { %596 = vrot.lane.b32.xlu0 %v1579_v22, %s1390_s13  ;;  %686 = vrot.lane.b32.xlu1 %v1581_v23, %s1389_s20 }
 0x126   : > { %724 = vrot.lane.b32.xlu0 %v1572_v14, %s1395_s24  ;;  %642 = vrot.lane.b32.xlu1 %v1581_v23, %s1388_s25 }
 0x12a   : > { %538 = vrot.lane.b32.xlu0 %v1579_v22, %s1391_s22  ;;  %598 = vrot.lane.b32.xlu1 %v1581_v23, %s1390_s13 }
 0x12e   : > { %494 = vrot.lane.b32.xlu0 %v1579_v22, %s1392_s15  ;;  %726 = vrot.lane.b32.xlu1 %v1577_v20, %s1395_s24  ;;  %v416_v20 = vld [vmem:[%s1859_s0] sm:$0x3] }
 0x132   : > { %450 = vrot.lane.b32.xlu0 %v1579_v22, %s1393_s23  ;;  %540 = vrot.lane.b32.xlu1 %v1581_v23, %s1391_s22 }
 0x136   : > { %405 = vrot.lane.b32.xlu0 %v1579_v22, %s1394_s16  ;;  %496 = vrot.lane.b32.xlu1 %v1581_v23, %s1392_s15  ;;  %s323_s15 = scalar_lea.vmem [#allocation6], %s1130_s21 }
 0x137   : > { %s1050_s26 = sshll.u32 %s323_s15, 4  ;;  %s1810_s26 = int_to_ptr.vmem [resolvable:$true] %s1050_s26 }
 0x138   : > { %s1318_s19 = scalar_lea.vmem %s1810_s26, 512 }
 0x139   : > { %p1319_p11 = scmp.ne.s32.totalorder %s1810_s26, %s1318_s19 }
 0x13a   : > { %728 = vrot.lane.b32.xlu0 %v1579_v22, %s1395_s24  ;;  %452 = vrot.lane.b32.xlu1 %v1581_v23, %s1393_s23  ;;  %v1136_v22 = vld [vmem:[%s1859_s0 + $0x2] sm:$0x3] }
 0x13b   : > { %p1320_p13 = pnand %p1319_p11, %p1877_p12 }
 0x13d   : > { %p1321_p4 = pneg %p1320_p13 }
 0x13e   : > { %792 = vperm.xlu0 %1283, %v788_v26   ;;  %407 = vrot.lane.b32.xlu1 %v1581_v23, %s1394_s16  ;;  %s1206_s16 = sshll.u32 %s1464_s9, 9  ;;  %s1396_s9 = smov [#allocation6]  }
 0x13f   : > { %s1815_s10 = scalar_lea.hbm %s1867_s8, %s1206_s16  ;;  %s1322_s25 = sshll.u32 %s1396_s9, 4  ;;  %s1323_s25 = int_to_ptr.vmem [resolvable:$false] %s1322_s25 }
 0x140   : > { %s1324_s20 = scalar_lea.vmem %s1323_s25, 1024  ;;  %p1325_p5 = scmp.lt.s32.totalorder %s1810_s26, %s1323_s25 }
 0x141   : > { %p1326_p7 = scmp.lt.s32.totalorder %s1324_s20, %s1318_s19 }
 0x142   : > { %957 = vperm.xlu0 %1283, %v953_v28   ;;  %730 = vrot.lane.b32.xlu1 %v1581_v23, %s1395_s24 }
 0x143   : > { %p1327_p8 = por %p1326_p7, %p1325_p5 }
 0x145   : > { %p1328_p10 = pnand %p1327_p8, %p1321_p4 }
 0x146   : > { %797 = vperm.xlu1 %1284, %v789_v29  }
 0x14a   : > { %962 = vperm.xlu1 %1284, %v954_v30  }
 0x174   : > { %v637_v31 = vpop.permute.xlu0 %636  ;;  %v681_v32 = vpop.permute.xlu1 %680 }
 0x178   : > { %v593_v33 = vpop.permute.xlu0 %592  ;;  %v683_v34 = vpop.permute.xlu1 %682 }
 0x17c   : > { %v1640_v35 = vpop.permute.xlu0 %534  ;;  %v639_v36 = vpop.permute.xlu1 %638 }
 0x180   : > { %v1642_v37 = vpop.permute.xlu0 %490  ;;  %v595_v38 = vpop.permute.xlu1 %594 }
 0x184   : > { %v1644_v39 = vpop.permute.xlu0 %446  ;;  %v1646_v40 = vpop.permute.xlu1 %536 }
 0x188   : > { %v1648_v42 = vpop.permute.xlu0 %401  ;;  %v1650_v43 = vpop.permute.xlu1 %492 }
 0x18c   : > { %v685_v46 = vpop.permute.xlu0 %684  ;;  %v1654_v47 = vpop.permute.xlu1 %448 }
 0x18d   : > { %v689_v56 = vsel %vm688_vm1, %v681_v32, %v685_v46  ;;  %v691_v57 = vsel %vm688_vm1, %v685_v46, %v681_v32 }
 0x18e   : > { %v706_v0 = vmul.f32 %v699_v53, %v689_v56  ;;  %v707_v7 = vmul.f32 %v703_v55, %v691_v57 }
 0x190   : > { %v641_v51 = vpop.permute.xlu0 %640  ;;  %v1664_v52 = vpop.permute.xlu1 %403 }
 0x191   : > { %v645_v9 = vsel %vm644_vm2, %v637_v31, %v641_v51  ;;  %v647_v10 = vsel %vm644_vm2, %v641_v51, %v637_v31 }
 0x192   : > { %v662_v21 = vmul.f32 %v655_v60, %v645_v9  ;;  %v663_v26 = vmul.f32 %v659_v61, %v647_v10 }
 0x194   : > { %v597_v58 = vpop.permute.xlu0 %596  ;;  %v687_v59 = vpop.permute.xlu1 %686 }
 0x195   : > { %v690_v62 = vsel %vm688_vm1, %v683_v34, %v687_v59  ;;  %v692_v63 = vsel %vm688_vm1, %v687_v59, %v683_v34  ;;  %v601_v29 = vsel %vm600_vm3, %v593_v33, %v597_v58  ;;  %v603_v30 = vsel %vm600_vm3, %v597_v58, %v593_v33  ;;  %v1142_v33 = vld [vmem:[%s1859_s0 + $0x6] sm:$0x3]  ;;  %v1139_v59 = vld [vmem:[%s1859_s0 + $0x4] sm:$0x3] }
 0x196   : > { %v708_v6 = vmul.f32 %v699_v53, %v690_v62  ;;  %v709_v8 = vmul.f32 %v703_v55, %v692_v63  ;;  %v618_v46 = vmul.f32 %v611_v16, %v601_v29  ;;  %v619_v50 = vmul.f32 %v615_v17, %v603_v30 }
 0x197   : > { %v553_v58 = vrot.slane %v1142_v33, %v1656_v48  ;;  %v513_v4 = vrot.slane %v1139_v59, %v1658_v49  ;;  %v421_v30 = vrot.slane %v416_v20, %v1656_v48 }
 0x198   : > { %v1682_v11 = vpop.permute.xlu0 %724  ;;  %v643_v12 = vpop.permute.xlu1 %642  ;;  %v1222_v13 = vpack.c.bf16 %v709_v8, %v707_v7  ;;  %v1221_v15 = vpack.c.bf16 %v708_v6, %v706_v0  ;;  %v509_v0 = vrot.slane %v1139_v59, %v1656_v48 }
 0x199   : > { %v646_v18 = vsel %vm644_vm2, %v639_v36, %v643_v12  ;;  %v648_v19 = vsel %vm644_vm2, %v643_v12, %v639_v36 }
 0x19a   : > { %v664_v27 = vmul.f32 %v655_v60, %v646_v18  ;;  %v665_v28 = vmul.f32 %v659_v61, %v648_v19  ;;  %902 = vmatprep.subr.bf16.mxu1 %v1222_v13 }
 0x19b   : > { %903 = vmatpush1.bf16.msra.mxu1 %v1221_v15  ;;  %v465_v15 = vrot.slane %v1136_v22, %v1656_v48 }
 0x19c   : > { %v539_v31 = vpop.permute.xlu0 %538  ;;  %v599_v32 = vpop.permute.xlu1 %598  ;;  %v1220_v34 = vpack.c.bf16 %v665_v28, %v663_v26  ;;  %v1219_v41 = vpack.c.bf16 %v664_v27, %v662_v21 }
 0x19d   : > { %v602_v44 = vsel %vm600_vm3, %v595_v38, %v599_v32  ;;  %v604_v36 = vsel %vm600_vm3, %v599_v32, %v595_v38  ;;  %v557_v38 = vrot.slane %v1142_v33, %v1658_v49  ;;  %v543_v60 = vsel %vm542_vm4, %v1640_v35, %v539_v31 }
 0x19e   : > { %v620_v51 = vmul.f32 %v611_v16, %v602_v44  ;;  %v621_v53 = vmul.f32 %v615_v17, %v604_v36  ;;  %904 = vmatprep.subr.bf16.mxu1 %v1220_v34  ;;  %v545_v61 = vsel %vm542_vm4, %v539_v31, %v1640_v35  ;;  %v469_v16 = vrot.slane %v1136_v22, %v1658_v49  ;;  %v1156_v44 = vld [vmem:[%s1859_s0 + $0x10] sm:$0x3] }
 0x19f   : > { %905 = vmatpush1.bf16.msra.mxu1 %v1219_v41  ;;  %v560_v7 = vmul.f32 %v553_v58, %v545_v61  ;;  %v561_v8 = vmul.f32 %v557_v38, %v543_v60  ;;  %v425_v31 = vrot.slane %v416_v20, %v1658_v49 }
 0x1a0   : > { %v495_v54 = vpop.permute.xlu0 %494  ;;  %v1702_v55 = vpop.permute.xlu1 %726  ;;  %v1218_v56 = vpack.c.bf16 %v621_v53, %v619_v50  ;;  %v1217_v57 = vpack.c.bf16 %v620_v51, %v618_v46 }
 0x1a1   : > { %v499_v9 = vsel %vm498_vm5, %v1642_v37, %v495_v54  ;;  %v501_v10 = vsel %vm498_vm5, %v495_v54, %v1642_v37 }
 0x1a2   : > { %906 = vmatprep.subr.bf16.mxu1 %v1218_v56  ;;  %v516_v18 = vmul.f32 %v509_v0, %v501_v10  ;;  %v517_v14 = vmul.f32 %v513_v4, %v499_v9  ;;  %v743_v56 = vrot.slane %v1156_v44, %v1656_v48 }
 0x1a3   : > { %907 = vmatpush1.bf16.msra.mxu1 %v1217_v57  ;;  %v747_v57 = vrot.slane %v1156_v44, %v1658_v49 }
 0x1a4   : > { %v451_v62 = vpop.permute.xlu0 %450  ;;  %908 = vmatprep.subr.bf16.mxu1 %v1216_v25  ;;  %v541_v63 = vpop.permute.xlu1 %540 }
 0x1a5   : > { %v544_v6 = vsel %vm542_vm4, %v1646_v40, %v541_v63  ;;  %v546_v35 = vsel %vm542_vm4, %v541_v63, %v1646_v40  ;;  %v455_v26 = vsel %vm454_vm6, %v1644_v39, %v451_v62  ;;  %v457_v27 = vsel %vm454_vm6, %v451_v62, %v1644_v39 }
 0x1a6   : > { %v562_v23 = vmul.f32 %v553_v58, %v546_v35  ;;  %v563_v25 = vmul.f32 %v557_v38, %v544_v6  ;;  %v472_v41 = vmul.f32 %v465_v15, %v457_v27  ;;  %v473_v39 = vmul.f32 %v469_v16, %v455_v26 }
 0x1a7   : > { %909 = vmatpush1.bf16.msra.mxu1 %v1215_v24 }
 0x1a8   : > { %v497_v40 = vpop.permute.xlu1 %496  ;;  %v1214_v12 = vpack.c.bf16 %v563_v25, %v561_v8  ;;  %v1213_v13 = vpack.c.bf16 %v562_v23, %v560_v7  ;;  %v406_v24 = vpop.permute.xlu0 %405  ;;  %v1286_v23 = vld [vmem:[%s1863_s4] ss:$8 sps:$4 sm:$0xff]  }
 0x1a9   : > { %v500_v17 = vsel %vm498_vm5, %v1650_v43, %v497_v40  ;;  %v502_v37 = vsel %vm498_vm5, %v497_v40, %v1650_v43  ;;  %v412_v50 = vsel %vm411_vm7, %v1648_v42, %v406_v24  ;;  %v414_v51 = vsel %vm411_vm7, %v406_v24, %v1648_v42 }
 0x1aa   : > { %v518_v19 = vmul.f32 %v509_v0, %v502_v37  ;;  %v519_v21 = vmul.f32 %v513_v4, %v500_v17  ;;  %910 = vmatprep.subr.bf16.mxu1 %v1214_v12  ;;  %v428_v42 = vmul.f32 %v421_v30, %v414_v51  ;;  %v429_v59 = vmul.f32 %v425_v31, %v412_v50 }
 0x1ab   : > { %911 = vmatpush1.bf16.msra.mxu1 %v1213_v13 }
 0x1ac   : > { %v453_v43 = vpop.permute.xlu1 %452  ;;  %v1212_v28 = vpack.c.bf16 %v519_v21, %v517_v14  ;;  %v1211_v29 = vpack.c.bf16 %v518_v19, %v516_v18  ;;  %v1289_v19 = vld [vmem:[%s1865_s6] sm:$0xff]  }
 0x1ad   : > { %v456_v32 = vsel %vm454_vm6, %v1654_v47, %v453_v43  ;;  %v458_v34 = vsel %vm454_vm6, %v453_v43, %v1654_v47  ;;  %v729_v47 = vpop.permute.xlu0 %728 }
 0x1ae   : > { %v474_v36 = vmul.f32 %v465_v15, %v458_v34  ;;  %v475_v46 = vmul.f32 %v469_v16, %v456_v32  ;;  %912 = vmatprep.subr.bf16.mxu1 %v1212_v28  ;;  %v733_v62 = vsel %vm732_vm8, %v1682_v11, %v729_v47  ;;  %v735_v48 = vsel %vm732_vm8, %v729_v47, %v1682_v11 }
 0x1af   : > { %913 = vmatpush1.bf16.msra.mxu1 %v1211_v29  ;;  %v750_v6 = vmul.f32 %v743_v56, %v733_v62  ;;  %v751_v35 = vmul.f32 %v747_v57, %v735_v48 }
 0x1b0   : > { %v408_v53 = vpop.permute.xlu1 %407  ;;  %v1210_v33 = vpack.c.bf16 %v475_v46, %v473_v39  ;;  %v1209_v54 = vpack.c.bf16 %v474_v36, %v472_v41 }
 0x1b1   : > { %v413_v58 = vsel %vm411_vm7, %v1664_v52, %v408_v53  ;;  %v415_v38 = vsel %vm411_vm7, %v408_v53, %v1664_v52 }
 0x1b2   : > { %v430_v60 = vmul.f32 %v421_v30, %v415_v38  ;;  %v431_v61 = vmul.f32 %v425_v31, %v413_v58  ;;  %914 = vmatprep.subr.bf16.mxu1 %v1210_v33 }
 0x1b3   : > { %915 = vmatpush1.bf16.msra.mxu1 %v1209_v54 }
 0x1b4   : > { %v731_v49 = vpop.permute.xlu1 %730  ;;  %v1208_v63 = vpack.c.bf16 %v431_v61, %v429_v59  ;;  %v1207_v0 = vpack.c.bf16 %v430_v60, %v428_v42 }
 0x1b5   : > { %v734_v52 = vsel %vm732_vm8, %v1702_v55, %v731_v49  ;;  %v736_v4 = vsel %vm732_vm8, %v731_v49, %v1702_v55 }
 0x1b6   : > { %v752_v7 = vmul.f32 %v743_v56, %v734_v52  ;;  %v753_v8 = vmul.f32 %v747_v57, %v736_v4  ;;  %916 = vmatprep.subr.bf16.mxu1 %v1208_v63 }
 0x1b7   : > { %917 = vmatpush1.bf16.msra.mxu1 %v1207_v0 }
 0x1b8   : > { %v1224_v22 = vpack.c.bf16 %v753_v8, %v751_v35  ;;  %v1223_v11 = vpack.c.bf16 %v752_v7, %v750_v6 }
 0x1b9   : > { %v793_v10 = vpop.permute.xlu0 %792 }
 0x1ba   : > { %932 = vmatprep.subr.bf16.mxu1 %v1224_v22 }
 0x1bb   : > { %933 = vmatpush2.bf16.msra.mxu1 %v1223_v11 }
 0x1bd   : > { %v958_v21 = vpop.permute.xlu0 %957 }
 0x1be   : > { %935 = vmatmul.mubr.bf16.vlgmr.msra.gmra.mxu1 %v1286_v23 }
 0x1c1   : > { %v798_v45 = vpop.permute.xlu1 %797 }
 0x1c5   : > { %v963_v30 = vpop.permute.xlu1 %962 }
 0x27e   : > { %v936_v25 = vpop.f32.mrf.mxu1 }
 0x27f   : > { %v937_v13 = vadd.f32 %v936_v25, %v793_v10 }
 0x280   : > { %v938_v9 = vpop.f32.mrf.mxu1 }
 0x281   : > { %v939_v40 = vadd.f32 %v938_v9, %v793_v10  ;;  %v945_v14 = vmax.f32 %v937_v13, 0.0 }
 0x282   : > { %v940_v55 = vpop.f32.mrf.mxu1 }
 0x283   : > { %v941_v12 = vadd.f32 %v940_v55, %v798_v45  ;;  %v946_v37 = vmax.f32 %v939_v40, 0.0 }
 0x284   : > { %v942_v15 = vpop.f32.mrf.mxu1 }
 0x285   : > { %v943_v16 = vadd.f32 %v942_v15, %v798_v45  ;;  %v947_v17 = vmax.f32 %v941_v12, 0.0 }
 0x287   : > { %v948_v18 = vmax.f32 %v943_v16, 0.0  ;;  %v951_v24 = vpack.c.bf16 %v947_v17, %v945_v14 }
 0x289   : > { %v952_v20 = vpack.c.bf16 %v948_v18, %v946_v37 }
 0x28b   : > { %987 = vmatprep.subr.bf16.mxu0 %v952_v20 }
 0x28c   : > { %988 = vmatpush1.bf16.msra.mxu0 %v951_v24 }
 0x28f   : > { %1181 = vmatmul.mubr.msk.bf16.vlgmr.msra.gmra.mxu0 %vm350_vm0, %v1289_v19 }
 0x34f   : > { %v1007_v26 = vpop.f32.mrf.mxu0 }
 0x350   : > { %v1008_v27 = vadd.f32 %v1007_v26, %v958_v21 }
 0x351   : > { %v1009_v43 = vpop.f32.mrf.mxu0 }
 0x352   : > { %v1016_v28 = vmax.f32 %v1008_v27, 0.0  ;;  %v1010_v29 = vadd.f32 %v1009_v43, %v958_v21 }
 0x353   : > { %v1011_v31 = vpop.f32.mrf.mxu0 }
 0x354   : > { %v1024_v32 = vadd.f32 %v1016_v28, %v1554_v3  ;;  %v1017_v34 = vmax.f32 %v1010_v29, 0.0  ;;  %v1012_v41 = vadd.f32 %v1011_v31, %v963_v30 }
 0x355   : > { %v1013_v39 = vpop.f32.mrf.mxu0 }
 0x356   : > { %v1028_v44 = vmax.f32 %v1024_v32, 0.0  ;;  %v1025_v36 = vadd.f32 %v1017_v34, %v1550_v1  ;;  %v1018_v46 = vmax.f32 %v1012_v41, 0.0  ;;  %v1014_v50 = vadd.f32 %v1013_v39, %v963_v30 }
 0x358   : > { %1032 = vst [vmem:[%s323_s15] sm:$0xff] %v1028_v44  ;;  %v1029_v51 = vmax.f32 %v1025_v36, 0.0  ;;  %v1026_v47 = vadd.f32 %v1018_v46, %v1558_v5  ;;  %v1019_v53 = vmax.f32 %v1014_v50, 0.0 }
 0x35a   : > { %1033 = vst [vmem:[%s323_s15 + $0x8] sm:$0xff] %v1029_v51  ;;  %v1030_v3 = vmax.f32 %v1026_v47, 0.0  ;;  %v1027_v33 = vadd.f32 %v1019_v53, %v1552_v2 }
 0x35c   : > { %1034 = vst [vmem:[%s323_s15 + $0x10] sm:$0xff] %v1030_v3  ;;  %v1031_v1 = vmax.f32 %v1027_v33, 0.0 }
 0x35e   : > { %1035 = vst [vmem:[%s323_s15 + $0x18] sm:$0xff] %v1031_v1 }
 0x35f   : > { %1331 = shalt.err (!%p1328_p10)
}
 0x360   : > { %s1332_s13 = scalar_lea.hbm %s1815_s10, 512  ;;  %s1336_s16 = scalar_lea.hbm %s1867_s8, 1024 }
 0x361   : > { %p1333_p0 = scmp.ne.s32.totalorder %s1815_s10, %s1332_s13  ;;  %p1337_p1 = scmp.lt.s32.totalorder %s1815_s10, %s1867_s8 }
 0x362   : > { %p1338_p3 = scmp.lt.s32.totalorder %s1336_s16, %s1332_s13 }
 0x363   : > { %p1334_p2 = pnand %p1333_p0, %p1877_p12 }
 0x364   : > { %p1339_p6 = por %p1338_p3, %p1337_p1 }
 0x365   : > { %p1335_p9 = pneg %p1334_p2 }
 0x367   : > { %p1340_p11 = pnand %p1339_p6, %p1335_p9 }
 0x369   : > { %1343 = shalt.err (!%p1340_p11)
}
 0x36a   : > { %s1397_s19 = smov 256  }
 0x36b   : > { %1227 = dma.vmem_to_hbm [thread:$0]  (%p1877_p12), %s1810_s26, 512, %s1815_s10, %s1037_s12, %s1397_s19, %s1397_s19, %s1393_s23  }
 0x36c PF: > { %s1065_s9 = sand.u32 1, %s1370_s27   ;;  %p1878_p13 = scmp.ne.s32.totalorder %s1874_s18, 0 }
 0x36d   : > { %p1879_p4 = scmp.ge.s32.totalorder %s1382_s30, 2  ;;  %s1066_s25 = scalar_lea.sflag [#allocation5], %s1065_s9 }
 0x36f   : > { %p1234_p5 = pnand %p1879_p4, %p1878_p13 }
 0x371   : > { %p1235_p7 = pneg %p1234_p5 }
 0x373   : > { %1365 = dma.done.wait (%p1235_p7), %s1066_s25, 512  }
 0x374   : > { %1367 = vsyncadd (%p1235_p7), %s1066_s25, 4294966784  ;;  %s1880_s17 = sld [smem:[#allocation9_spill]]  ;;  %p21_p8 = scmp.ge.s32.totalorder %s1468_s11, 4  }
 0x375   : > { %s1881_s27 = smov %s1374_s28  ;;  %s1882_s28 = smov %s1378_s29 }
 0x376   : > { %s1884_s30 = smov %s1468_s11  ;;  %23 = sbr.rel (!%p21_p8) target bundleno = 5 (0x5), region = 104 }
 0x37a   : > { %s1883_s29 = smov %s1880_s17 }
 0x37b   :  { %1071 = vsyncpa [#allocation4], 1 }
 0x37c   :  { %1073 = vsyncpa [#allocation4 + $0x1], 1 }
 0x37d   :  { %1074 = vsyncpa [#allocation5], 1 }
 0x37e   :  { %1076 = vsyncpa [#allocation5 + $0x1], 1 }

// kernel: tpu_custom_call.1
= control target key start
LH: loop header
LB: loop body
LE: loop exit
PB: predicated region body
PF: predicated region fallthrough
CT: control target
= control target key end

     0   :  { %13 = vsyncpa [#allocation4], 0  ;;  %s1859_s0 = inlined_call_operand.vmem [shape: f32[9,1,256], index: 0, kind: input, shape index: {}]   ;;  %s1860_s1 = inlined_call_operand.hbm [shape: f32[2,16,256], index: 1, kind: input, shape index: {}]   ;;  %s1861_s2 = inlined_call_operand.vmem [shape: bf16[16,16], index: 2, kind: input, shape index: {}]   ;;  %s1862_s3 = inlined_call_operand.vmem [shape: f32[16,1], index: 3, kind: input, shape index: {}]   ;;  %s1863_s4 = inlined_call_operand.vmem [shape: bf16[16,144], index: 4, kind: input, shape index: {}]   ;;  %s1864_s5 = inlined_call_operand.vmem [shape: f32[16,1], index: 5, kind: input, shape index: {}]   ;;  %s1865_s6 = inlined_call_operand.vmem [shape: bf16[16,16], index: 6, kind: input, shape index: {}]   ;;  %s1866_s7 = inlined_call_operand.vmem [shape: f32[16,1], index: 7, kind: input, shape index: {}]   ;;  %s1867_s8 = inlined_call_operand.hbm [shape: f32[2,16,256], index: 8, kind: output, shape index: {}]  }
   0x1   :  { %15 = vsyncpa [#allocation4 + $0x1], 0 }
   0x2   :  { %16 = vsyncpa [#allocation5], 0 }
   0x3   :  { %18 = vsyncpa [#allocation5 + $0x1], 0  ;;  %s1443_s27 = smov 0   ;;  %s1445_s28 = smov 0  }
   0x4   :  { %s1447_s29 = smov 0   ;;  %s1449_s30 = smov 0  }
   0x5 LB: > { %s1464_s9 = sadd.s32 4294967295, %s1382_s30   ;;  %s1123_s10 = sadd.s32 4294967294, %s1382_s30   ;;  %s1382_s30 = sphi %s1449_s30, %s1884_s30   ;;  %s1378_s29 = sphi %s1447_s29, %s1883_s29   ;;  %s1374_s28 = sphi %s1445_s28, %s1882_s28   ;;  %s1370_s27 = sphi %s1443_s27, %s1881_s27  }
   0x6   : > { %s1468_s11 = sadd.s32 1, %s1382_s30   ;;  %s52_s12 = sadd.s32 1, %s1378_s29 }
   0x7   : > { %s49_s13 = ssub.s32 %s1382_s30, %s1468_s11  ;;  %p59_p0 = scmp.ne.s32.totalorder %s1378_s29, %s1374_s28 }
   0x8   : > { %p50_p1 = scmp.eq.s32.totalorder %s49_s13, 0  ;;  %p60_p2 = scmp.eq.s32.totalorder %s1382_s30, 0 }
   0x9   : > { %p65_p3 = scmp.ne.s32.totalorder %s1374_s28, %s1370_s27  ;;  %p66_p4 = scmp.eq.s32.totalorder %s1464_s9, 0 }
   0xa   : > { %s1480_s14 = scalar_select %p50_p1, %s1378_s29, %s52_s12  }
   0xb   : > { %p1482_p5 = por %p60_p2, %p59_p0  ;;  %p1486_p6 = por %p66_p4, %p65_p3 }
   0xc   : > { %1870 = sst [smem:[#allocation9_spill]] %s1480_s14  ;;  %p215_p7 = scmp.eq.s32.totalorder %s1464_s9, 1 }
   0xd   : > { %s1872_s16 = scalar_select %p1486_p6, 1, 0 }
   0xe   : > { %p221_p8 = scmp.eq.s32.totalorder %s1123_s10, 1  ;;  %p1237_p10 = scmp.lt.s32.totalorder %s1382_s30, 2 }
   0xf   : > { %p1493_p11 = por %p215_p7, %p59_p0  ;;  %s262_s19 = sand.u32 1, %s1378_s29  }
  0x10   : > { %p1497_p12 = por %p221_p8, %p65_p3  ;;  %s1187_s20 = sshll.u32 %s1382_s30, 9 }
  0x11   : > { %s1873_s17 = scalar_select %p1493_p11, 1, 0 }
  0x12   : > { %s1874_s18 = scalar_select %p1497_p12, 1, 0 }
  0x13   : > { %s1126_s21 = sshll.u32 %s262_s19, 5  ;;  %s1506_s24 = scalar_lea.hbm %s1860_s1, %s1187_s20 }
  0x14   : > { %s266_s25 = scalar_lea.vmem [#allocation3], %s1126_s21  ;;  %p1510_p13 = pnand %p1237_p10, %p1482_p5 }
  0x15   : > { %s273_s26 = sshll.u32 %s266_s25, 4  ;;  %s1516_s12 = scalar_lea.sflag [#allocation4], %s262_s19  ;;  %s1514_s26 = int_to_ptr.vmem [resolvable:$true] %s273_s26 }
  0x16   : > { %s1290_s13 = scalar_lea.hbm %s1506_s24, 512  ;;  %p1292_p1 = pneg %p1510_p13 }
  0x17   : > { %p1291_p0 = scmp.ne.s32.totalorder %s1506_s24, %s1290_s13  ;;  %s1295_s21 = scalar_lea.hbm %s1860_s1, 1024 }
  0x18   : > { %p1296_p4 = scmp.lt.s32.totalorder %s1506_s24, %s1860_s1  ;;  %p1297_p5 = scmp.lt.s32.totalorder %s1295_s21, %s1290_s13 }
  0x19   : > { %p1293_p2 = pnand %p1292_p1, %p1291_p0 }
  0x1a   : > { %p1298_p7 = por %p1297_p5, %p1296_p4 }
  0x1b   : > { %p1294_p3 = pneg %p1293_p2 }
  0x1d   : > { %p1299_p8 = pnand %p1298_p7, %p1294_p3 }
  0x1f   : > { %1302 = shalt.err (!%p1299_p8)
}
  0x20   : > { %s1303_s19 = scalar_lea.vmem %s1514_s26, 512  ;;  %s1384_s25 = smov [#allocation3]  }
  0x21   : > { %p1304_p10 = scmp.ne.s32.totalorder %s1514_s26, %s1303_s19  ;;  %s1308_s14 = sshll.u32 %s1384_s25, 4  ;;  %s1309_s14 = int_to_ptr.vmem [resolvable:$false] %s1308_s14 }
  0x22   : > { %s1310_s20 = scalar_lea.vmem %s1309_s14, 1024  ;;  %p1311_p2 = scmp.lt.s32.totalorder %s1514_s26, %s1309_s14 }
  0x23   : > { %p1306_p9 = pnand %p1304_p10, %p1292_p1  ;;  %p1312_p12 = scmp.lt.s32.totalorder %s1310_s20, %s1303_s19 }
  0x25   : > { %p1307_p0 = pneg %p1306_p9  ;;  %p1313_p11 = por %p1312_p12, %p1311_p2 }
  0x27   : > { %p1314_p6 = pnand %p1313_p11, %p1307_p0 }
  0x29   : > { %1317 = shalt.err (!%p1314_p6)
}
  0x2a   : > { %s1385_s13 = smov 256   ;;  %s1386_s22 = smov 16  }
  0x2b   : > { %1232 = dma.hbm_to_vmem [thread:$0]  (!%p1510_p13), %s1506_s24, 512, %s1514_s26, %s1516_s12, %s1385_s13, %s1385_s13, %s1386_s22  }
  0x2c   : > { %p1129_p9 = scmp.ge.s32.totalorder %s1382_s30, 1  ;;  %p281_p1 = scmp.lt.s32.totalorder %s1382_s30, 3 }
  0x2e   : > { %p282_p3 = pnand %p1129_p9, %p281_p1 }
  0x2f   : > { %s1540_s14 = sand.u32 (!%p282_p3), 1, %s1374_s28   ;;  %p1876_p6 = scmp.ne.s32.totalorder (!%p282_p3), %s1872_s16, 0 }
  0x30   : > { %285 = sbr.rel (%p282_p3) target bundleno = 876 (0x36c), region = 52  ;;  %s1130_s21 = sshll.u32 (!%p282_p3), %s1540_s14, 5 }
  0x31   : > { %s288_s15 = scalar_lea.sflag (!%p282_p3), [#allocation4], %s1540_s14  ;;  %s291_s23 = scalar_lea.vmem (!%p282_p3), [#allocation3], %s1130_s21 }
  0x35   : > { %1361 = dma.done.wait (%p1876_p6), %s288_s15, 512  }
  0x36   : > { %1363 = vsyncadd (%p1876_p6), %s288_s15, 4294966784  ;;  %v1387_v0 = vmov 0   ;;  %v1550_v1 = vld [vmem:[%s291_s23 + $0x8] sm:$0xff]  ;;  %v1552_v2 = vld [vmem:[%s291_s23 + $0x18] sm:$0xff]  ;;  %vm350_vm0 = vcmask 130048   ;;  %s1388_s25 = smov 113   ;;  %v409_v41 = vlaneseq }
  0x37   : > { %386 = vmatprep.mubr.bf16.mxu0 %v1387_v0  ;;  %1283 = vset.pattern.permute.xlu0 %v1387_v0  ;;  %v1554_v3 = vld [vmem:[%s291_s23] sm:$0xff]  ;;  %v330_v4 = vpack.c.bf16 %v1552_v2, %v1550_v1  ;;  %v1558_v5 = vld [vmem:[%s291_s23 + $0x10] sm:$0xff]  ;;  %v334_v9 = vld [vmem:[%s1862_s3 + $0x8] sm:$0xff]  ;;  %s1389_s20 = smov 112   ;;  %s1390_s13 = smov 127  }
  0x38   : > { %1284 = vset.pattern.permute.xlu1 %v1387_v0  ;;  %v329_v6 = vpack.c.bf16 %v1558_v5, %v1554_v3  ;;  %v1285_v7 = vld [vmem:[%s1861_s2] sm:$0xff]   ;;  %s1391_s22 = smov 1   ;;  %s1392_s15 = smov 15   ;;  %v789_v29 = vld [vmem:[%s1864_s5 + $0x8] sm:$0xff]  ;;  %v419_v44 = vshrl.u32 %v409_v41, 7  ;;  %v1652_v45 = vand.u32 127, %v409_v41 }
  0x39   : > { %v333_v8 = vld [vmem:[%s1862_s3] sm:$0xff]  ;;  %368 = vmatprep.subr.bf16.mxu0 %v330_v4  ;;  %s1393_s23 = smov 16   ;;  %s1394_s16 = smov 17   ;;  %v954_v30 = vld [vmem:[%s1866_s7 + $0x8] sm:$0xff] }
  0x3a   : > { %337 = vperm.xlu0 %1283, %v333_v8   ;;  %369 = vmatpush1.bf16.msra.mxu0 %v329_v6  ;;  %s1395_s24 = smov 111   ;;  %v788_v26 = vld [vmem:[%s1864_s5] sm:$0xff]  ;;  %v1656_v48 = vsub.s32 0, %v419_v44  ;;  %v1658_v49 = vsub.s32 1, %v419_v44  ;;  %v1153_v50 = vld [vmem:[%s1859_s0 + $0xe] sm:$0x3] }
  0x3b   : > { %v1288_v27 = vld [vmem:[%s1863_s4 + $0x4] ss:$8 sps:$4 sm:$0xff]   ;;  %vm688_vm1 = vcmp.lt.s32.totalorder %v1652_v45, 112  ;;  %vm644_vm2 = vcmp.lt.s32.totalorder %v1652_v45, 113  ;;  %v1147_v4 = vld [vmem:[%s1859_s0 + $0xa] sm:$0x3] }
  0x3c   : > { %1179 = vmatprep.mubr.msk.bf16.mxu1 %vm350_vm0, %v1288_v27  ;;  %v953_v28 = vld [vmem:[%s1866_s7] sm:$0xff]  ;;  %v699_v53 = vrot.slane %v1153_v50, %v1656_v48  ;;  %v1150_v54 = vld [vmem:[%s1859_s0 + $0xc] sm:$0x3]  ;;  %v703_v55 = vrot.slane %v1153_v50, %v1658_v49  ;;  %vm600_vm3 = vcmp.lt.s32.totalorder %v1652_v45, 127  ;;  %vm542_vm4 = vcmp.lt.s32.totalorder %v1652_v45, 1  ;;  %s1037_s12 = scalar_lea.sflag [#allocation5], %s1540_s14 }
  0x3d   : > { %1133 = vmatmul.mubr.msk.bf16.vlgmr.msra.gmra.mxu0 %vm350_vm0, %v1285_v7  ;;  %v655_v60 = vrot.slane %v1150_v54, %v1656_v48  ;;  %v659_v61 = vrot.slane %v1150_v54, %v1658_v49  ;;  %vm498_vm5 = vcmp.lt.s32.totalorder %v1652_v45, 15  ;;  %vm454_vm6 = vcmp.lt.s32.totalorder %v1652_v45, 16  ;;  %p1877_p12 = scmp.ne.s32.totalorder %s1873_s17, 0 }
  0x3e   : > { %342 = vperm.xlu0 %1283, %v334_v9   ;;  %1005 = vmatprep.mubr.bf16.mxu0 %v1387_v0  ;;  %vm411_vm7 = vcmp.lt.s32.totalorder %v1652_v45, 17  ;;  %vm732_vm8 = vcmp.lt.s32.totalorder %v1652_v45, 111 }
  0xb5   : > { %v338_v10 = vpop.permute.xlu0 %337 }
  0xb9   : > { %v343_v15 = vpop.permute.xlu0 %342 }
  0xfd   : > { %v388_v11 = vpop.f32.mrf.mxu0 }
  0xfe   : > { %v389_v12 = vadd.f32 %v388_v11, %v338_v10 }
  0xff   : > { %v390_v13 = vpop.f32.mrf.mxu0 }
 0x100   : > { %v1572_v14 = vmax.f32 %v389_v12, 0.0  ;;  %v391_v17 = vadd.f32 %v390_v13, %v338_v10 }
 0x101   : > { %v392_v16 = vpop.f32.mrf.mxu0 }
 0x102   : > { %v393_v18 = vadd.f32 %v392_v16, %v343_v15  ;;  %636 = vrot.lane.b32.xlu0 %v1572_v14, %s1388_s25  ;;  %680 = vrot.lane.b32.xlu1 %v1572_v14, %s1389_s20  ;;  %v1579_v22 = vmax.f32 %v391_v17, 0.0  ;;  %v611_v16 = vrot.slane %v1147_v4, %v1656_v48  ;;  %v615_v17 = vrot.slane %v1147_v4, %v1658_v49 }
 0x103   : > { %v394_v19 = vpop.f32.mrf.mxu0 }
 0x104   : > { %v1577_v20 = vmax.f32 %v393_v18, 0.0  ;;  %v395_v21 = vadd.f32 %v394_v19, %v343_v15 }
 0x106   : > { %v1581_v23 = vmax.f32 %v395_v21, 0.0  ;;  %592 = vrot.lane.b32.xlu0 %v1572_v14, %s1390_s13  ;;  %682 = vrot.lane.b32.xlu1 %v1577_v20, %s1389_s20  ;;  %v1215_v24 = vpack.c.bf16 %v1577_v20, %v1572_v14 }
 0x108   : > { %v1216_v25 = vpack.c.bf16 %v1581_v23, %v1579_v22 }
 0x10a   : > { %534 = vrot.lane.b32.xlu0 %v1572_v14, %s1391_s22  ;;  %638 = vrot.lane.b32.xlu1 %v1577_v20, %s1388_s25 }
 0x10e   : > { %490 = vrot.lane.b32.xlu0 %v1572_v14, %s1392_s15  ;;  %594 = vrot.lane.b32.xlu1 %v1577_v20, %s1390_s13 }
 0x112   : > { %446 = vrot.lane.b32.xlu0 %v1572_v14, %s1393_s23  ;;  %536 = vrot.lane.b32.xlu1 %v1577_v20, %s1391_s22 }
 0x116   : > { %401 = vrot.lane.b32.xlu0 %v1572_v14, %s1394_s16  ;;  %492 = vrot.lane.b32.xlu1 %v1577_v20, %s1392_s15 }
 0x11a   : > { %684 = vrot.lane.b32.xlu0 %v1579_v22, %s1389_s20  ;;  %448 = vrot.lane.b32.xlu1 %v1577_v20, %s1393_s23 }
 0x11e   : > { %640 = vrot.lane.b32.xlu0 %v1579_v22, %s1388_s25  ;;  %403 = vrot.lane.b32.xlu1 %v1577_v20, %s1394_s16 }
 0x122   : > { %596 = vrot.lane.b32.xlu0 %v1579_v22, %s1390_s13  ;;  %686 = vrot.lane.b32.xlu1 %v1581_v23, %s1389_s20 }
 0x126   : > { %724 = vrot.lane.b32.xlu0 %v1572_v14, %s1395_s24  ;;  %642 = vrot.lane.b32.xlu1 %v1581_v23, %s1388_s25 }
 0x12a   : > { %538 = vrot.lane.b32.xlu0 %v1579_v22, %s1391_s22  ;;  %598 = vrot.lane.b32.xlu1 %v1581_v23, %s1390_s13 }
 0x12e   : > { %494 = vrot.lane.b32.xlu0 %v1579_v22, %s1392_s15  ;;  %726 = vrot.lane.b32.xlu1 %v1577_v20, %s1395_s24  ;;  %v416_v20 = vld [vmem:[%s1859_s0] sm:$0x3] }
 0x132   : > { %450 = vrot.lane.b32.xlu0 %v1579_v22, %s1393_s23  ;;  %540 = vrot.lane.b32.xlu1 %v1581_v23, %s1391_s22 }
 0x136   : > { %405 = vrot.lane.b32.xlu0 %v1579_v22, %s1394_s16  ;;  %496 = vrot.lane.b32.xlu1 %v1581_v23, %s1392_s15  ;;  %s323_s15 = scalar_lea.vmem [#allocation6], %s1130_s21 }
 0x137   : > { %s1050_s26 = sshll.u32 %s323_s15, 4  ;;  %s1810_s26 = int_to_ptr.vmem [resolvable:$true] %s1050_s26 }
 0x138   : > { %s1318_s19 = scalar_lea.vmem %s1810_s26, 512 }
 0x139   : > { %p1319_p11 = scmp.ne.s32.totalorder %s1810_s26, %s1318_s19 }
 0x13a   : > { %728 = vrot.lane.b32.xlu0 %v1579_v22, %s1395_s24  ;;  %452 = vrot.lane.b32.xlu1 %v1581_v23, %s1393_s23  ;;  %v1136_v22 = vld [vmem:[%s1859_s0 + $0x2] sm:$0x3] }
 0x13b   : > { %p1320_p13 = pnand %p1319_p11, %p1877_p12 }
 0x13d   : > { %p1321_p4 = pneg %p1320_p13 }
 0x13e   : > { %792 = vperm.xlu0 %1283, %v788_v26   ;;  %407 = vrot.lane.b32.xlu1 %v1581_v23, %s1394_s16  ;;  %s1206_s16 = sshll.u32 %s1464_s9, 9  ;;  %s1396_s9 = smov [#allocation6]  }
 0x13f   : > { %s1815_s10 = scalar_lea.hbm %s1867_s8, %s1206_s16  ;;  %s1322_s25 = sshll.u32 %s1396_s9, 4  ;;  %s1323_s25 = int_to_ptr.vmem [resolvable:$false] %s1322_s25 }
 0x140   : > { %s1324_s20 = scalar_lea.vmem %s1323_s25, 1024  ;;  %p1325_p5 = scmp.lt.s32.totalorder %s1810_s26, %s1323_s25 }
 0x141   : > { %p1326_p7 = scmp.lt.s32.totalorder %s1324_s20, %s1318_s19 }
 0x142   : > { %957 = vperm.xlu0 %1283, %v953_v28   ;;  %730 = vrot.lane.b32.xlu1 %v1581_v23, %s1395_s24 }
 0x143   : > { %p1327_p8 = por %p1326_p7, %p1325_p5 }
 0x145   : > { %p1328_p10 = pnand %p1327_p8, %p1321_p4 }
 0x146   : > { %797 = vperm.xlu1 %1284, %v789_v29  }
 0x14a   : > { %962 = vperm.xlu1 %1284, %v954_v30  }
 0x174   : > { %v637_v31 = vpop.permute.xlu0 %636  ;;  %v681_v32 = vpop.permute.xlu1 %680 }
 0x178   : > { %v593_v33 = vpop.permute.xlu0 %592  ;;  %v683_v34 = vpop.permute.xlu1 %682 }
 0x17c   : > { %v1640_v35 = vpop.permute.xlu0 %534  ;;  %v639_v36 = vpop.permute.xlu1 %638 }
 0x180   : > { %v1642_v37 = vpop.permute.xlu0 %490  ;;  %v595_v38 = vpop.permute.xlu1 %594 }
 0x184   : > { %v1644_v39 = vpop.permute.xlu0 %446  ;;  %v1646_v40 = vpop.permute.xlu1 %536 }
 0x188   : > { %v1648_v42 = vpop.permute.xlu0 %401  ;;  %v1650_v43 = vpop.permute.xlu1 %492 }
 0x18c   : > { %v685_v46 = vpop.permute.xlu0 %684  ;;  %v1654_v47 = vpop.permute.xlu1 %448 }
 0x18d   : > { %v689_v56 = vsel %vm688_vm1, %v681_v32, %v685_v46  ;;  %v691_v57 = vsel %vm688_vm1, %v685_v46, %v681_v32 }
 0x18e   : > { %v706_v0 = vmul.f32 %v699_v53, %v689_v56  ;;  %v707_v7 = vmul.f32 %v703_v55, %v691_v57 }
 0x190   : > { %v641_v51 = vpop.permute.xlu0 %640  ;;  %v1664_v52 = vpop.permute.xlu1 %403 }
 0x191   : > { %v645_v9 = vsel %vm644_vm2, %v637_v31, %v641_v51  ;;  %v647_v10 = vsel %vm644_vm2, %v641_v51, %v637_v31 }
 0x192   : > { %v662_v21 = vmul.f32 %v655_v60, %v645_v9  ;;  %v663_v26 = vmul.f32 %v659_v61, %v647_v10 }
 0x194   : > { %v597_v58 = vpop.permute.xlu0 %596  ;;  %v687_v59 = vpop.permute.xlu1 %686 }
 0x195   : > { %v690_v62 = vsel %vm688_vm1, %v683_v34, %v687_v59  ;;  %v692_v63 = vsel %vm688_vm1, %v687_v59, %v683_v34  ;;  %v601_v29 = vsel %vm600_vm3, %v593_v33, %v597_v58  ;;  %v603_v30 = vsel %vm600_vm3, %v597_v58, %v593_v33  ;;  %v1142_v33 = vld [vmem:[%s1859_s0 + $0x6] sm:$0x3]  ;;  %v1139_v59 = vld [vmem:[%s1859_s0 + $0x4] sm:$0x3] }
 0x196   : > { %v708_v6 = vmul.f32 %v699_v53, %v690_v62  ;;  %v709_v8 = vmul.f32 %v703_v55, %v692_v63  ;;  %v618_v46 = vmul.f32 %v611_v16, %v601_v29  ;;  %v619_v50 = vmul.f32 %v615_v17, %v603_v30 }
 0x197   : > { %v553_v58 = vrot.slane %v1142_v33, %v1656_v48  ;;  %v513_v4 = vrot.slane %v1139_v59, %v1658_v49  ;;  %v421_v30 = vrot.slane %v416_v20, %v1656_v48 }
 0x198   : > { %v1682_v11 = vpop.permute.xlu0 %724  ;;  %v643_v12 = vpop.permute.xlu1 %642  ;;  %v1222_v13 = vpack.c.bf16 %v709_v8, %v707_v7  ;;  %v1221_v15 = vpack.c.bf16 %v708_v6, %v706_v0  ;;  %v509_v0 = vrot.slane %v1139_v59, %v1656_v48 }
 0x199   : > { %v646_v18 = vsel %vm644_vm2, %v639_v36, %v643_v12  ;;  %v648_v19 = vsel %vm644_vm2, %v643_v12, %v639_v36 }
 0x19a   : > { %v664_v27 = vmul.f32 %v655_v60, %v646_v18  ;;  %v665_v28 = vmul.f32 %v659_v61, %v648_v19  ;;  %902 = vmatprep.subr.bf16.mxu1 %v1222_v13 }
 0x19b   : > { %903 = vmatpush1.bf16.msra.mxu1 %v1221_v15  ;;  %v465_v15 = vrot.slane %v1136_v22, %v1656_v48 }
 0x19c   : > { %v539_v31 = vpop.permute.xlu0 %538  ;;  %v599_v32 = vpop.permute.xlu1 %598  ;;  %v1220_v34 = vpack.c.bf16 %v665_v28, %v663_v26  ;;  %v1219_v41 = vpack.c.bf16 %v664_v27, %v662_v21 }
 0x19d   : > { %v602_v44 = vsel %vm600_vm3, %v595_v38, %v599_v32  ;;  %v604_v36 = vsel %vm600_vm3, %v599_v32, %v595_v38  ;;  %v557_v38 = vrot.slane %v1142_v33, %v1658_v49  ;;  %v543_v60 = vsel %vm542_vm4, %v1640_v35, %v539_v31 }
 0x19e   : > { %v620_v51 = vmul.f32 %v611_v16, %v602_v44  ;;  %v621_v53 = vmul.f32 %v615_v17, %v604_v36  ;;  %904 = vmatprep.subr.bf16.mxu1 %v1220_v34  ;;  %v545_v61 = vsel %vm542_vm4, %v539_v31, %v1640_v35  ;;  %v469_v16 = vrot.slane %v1136_v22, %v1658_v49  ;;  %v1156_v44 = vld [vmem:[%s1859_s0 + $0x10] sm:$0x3] }
 0x19f   : > { %905 = vmatpush1.bf16.msra.mxu1 %v1219_v41  ;;  %v560_v7 = vmul.f32 %v553_v58, %v545_v61  ;;  %v561_v8 = vmul.f32 %v557_v38, %v543_v60  ;;  %v425_v31 = vrot.slane %v416_v20, %v1658_v49 }
 0x1a0   : > { %v495_v54 = vpop.permute.xlu0 %494  ;;  %v1702_v55 = vpop.permute.xlu1 %726  ;;  %v1218_v56 = vpack.c.bf16 %v621_v53, %v619_v50  ;;  %v1217_v57 = vpack.c.bf16 %v620_v51, %v618_v46 }
 0x1a1   : > { %v499_v9 = vsel %vm498_vm5, %v1642_v37, %v495_v54  ;;  %v501_v10 = vsel %vm498_vm5, %v495_v54, %v1642_v37 }
 0x1a2   : > { %906 = vmatprep.subr.bf16.mxu1 %v1218_v56  ;;  %v516_v18 = vmul.f32 %v509_v0, %v501_v10  ;;  %v517_v14 = vmul.f32 %v513_v4, %v499_v9  ;;  %v743_v56 = vrot.slane %v1156_v44, %v1656_v48 }
 0x1a3   : > { %907 = vmatpush1.bf16.msra.mxu1 %v1217_v57  ;;  %v747_v57 = vrot.slane %v1156_v44, %v1658_v49 }
 0x1a4   : > { %v451_v62 = vpop.permute.xlu0 %450  ;;  %908 = vmatprep.subr.bf16.mxu1 %v1216_v25  ;;  %v541_v63 = vpop.permute.xlu1 %540 }
 0x1a5   : > { %v544_v6 = vsel %vm542_vm4, %v1646_v40, %v541_v63  ;;  %v546_v35 = vsel %vm542_vm4, %v541_v63, %v1646_v40  ;;  %v455_v26 = vsel %vm454_vm6, %v1644_v39, %v451_v62  ;;  %v457_v27 = vsel %vm454_vm6, %v451_v62, %v1644_v39 }
 0x1a6   : > { %v562_v23 = vmul.f32 %v553_v58, %v546_v35  ;;  %v563_v25 = vmul.f32 %v557_v38, %v544_v6  ;;  %v472_v41 = vmul.f32 %v465_v15, %v457_v27  ;;  %v473_v39 = vmul.f32 %v469_v16, %v455_v26 }
 0x1a7   : > { %909 = vmatpush1.bf16.msra.mxu1 %v1215_v24 }
 0x1a8   : > { %v497_v40 = vpop.permute.xlu1 %496  ;;  %v1214_v12 = vpack.c.bf16 %v563_v25, %v561_v8  ;;  %v1213_v13 = vpack.c.bf16 %v562_v23, %v560_v7  ;;  %v406_v24 = vpop.permute.xlu0 %405  ;;  %v1286_v23 = vld [vmem:[%s1863_s4] ss:$8 sps:$4 sm:$0xff]  }
 0x1a9   : > { %v500_v17 = vsel %vm498_vm5, %v1650_v43, %v497_v40  ;;  %v502_v37 = vsel %vm498_vm5, %v497_v40, %v1650_v43  ;;  %v412_v50 = vsel %vm411_vm7, %v1648_v42, %v406_v24  ;;  %v414_v51 = vsel %vm411_vm7, %v406_v24, %v1648_v42 }
 0x1aa   : > { %v518_v19 = vmul.f32 %v509_v0, %v502_v37  ;;  %v519_v21 = vmul.f32 %v513_v4, %v500_v17  ;;  %910 = vmatprep.subr.bf16.mxu1 %v1214_v12  ;;  %v428_v42 = vmul.f32 %v421_v30, %v414_v51  ;;  %v429_v59 = vmul.f32 %v425_v31, %v412_v50 }
 0x1ab   : > { %911 = vmatpush1.bf16.msra.mxu1 %v1213_v13 }
 0x1ac   : > { %v453_v43 = vpop.permute.xlu1 %452  ;;  %v1212_v28 = vpack.c.bf16 %v519_v21, %v517_v14  ;;  %v1211_v29 = vpack.c.bf16 %v518_v19, %v516_v18  ;;  %v1289_v19 = vld [vmem:[%s1865_s6] sm:$0xff]  }
 0x1ad   : > { %v456_v32 = vsel %vm454_vm6, %v1654_v47, %v453_v43  ;;  %v458_v34 = vsel %vm454_vm6, %v453_v43, %v1654_v47  ;;  %v729_v47 = vpop.permute.xlu0 %728 }
 0x1ae   : > { %v474_v36 = vmul.f32 %v465_v15, %v458_v34  ;;  %v475_v46 = vmul.f32 %v469_v16, %v456_v32  ;;  %912 = vmatprep.subr.bf16.mxu1 %v1212_v28  ;;  %v733_v62 = vsel %vm732_vm8, %v1682_v11, %v729_v47  ;;  %v735_v48 = vsel %vm732_vm8, %v729_v47, %v1682_v11 }
 0x1af   : > { %913 = vmatpush1.bf16.msra.mxu1 %v1211_v29  ;;  %v750_v6 = vmul.f32 %v743_v56, %v733_v62  ;;  %v751_v35 = vmul.f32 %v747_v57, %v735_v48 }
 0x1b0   : > { %v408_v53 = vpop.permute.xlu1 %407  ;;  %v1210_v33 = vpack.c.bf16 %v475_v46, %v473_v39  ;;  %v1209_v54 = vpack.c.bf16 %v474_v36, %v472_v41 }
 0x1b1   : > { %v413_v58 = vsel %vm411_vm7, %v1664_v52, %v408_v53  ;;  %v415_v38 = vsel %vm411_vm7, %v408_v53, %v1664_v52 }
 0x1b2   : > { %v430_v60 = vmul.f32 %v421_v30, %v415_v38  ;;  %v431_v61 = vmul.f32 %v425_v31, %v413_v58  ;;  %914 = vmatprep.subr.bf16.mxu1 %v1210_v33 }
 0x1b3   : > { %915 = vmatpush1.bf16.msra.mxu1 %v1209_v54 }
 0x1b4   : > { %v731_v49 = vpop.permute.xlu1 %730  ;;  %v1208_v63 = vpack.c.bf16 %v431_v61, %v429_v59  ;;  %v1207_v0 = vpack.c.bf16 %v430_v60, %v428_v42 }
 0x1b5   : > { %v734_v52 = vsel %vm732_vm8, %v1702_v55, %v731_v49  ;;  %v736_v4 = vsel %vm732_vm8, %v731_v49, %v1702_v55 }
 0x1b6   : > { %v752_v7 = vmul.f32 %v743_v56, %v734_v52  ;;  %v753_v8 = vmul.f32 %v747_v57, %v736_v4  ;;  %916 = vmatprep.subr.bf16.mxu1 %v1208_v63 }
 0x1b7   : > { %917 = vmatpush1.bf16.msra.mxu1 %v1207_v0 }
 0x1b8   : > { %v1224_v22 = vpack.c.bf16 %v753_v8, %v751_v35  ;;  %v1223_v11 = vpack.c.bf16 %v752_v7, %v750_v6 }
 0x1b9   : > { %v793_v10 = vpop.permute.xlu0 %792 }
 0x1ba   : > { %932 = vmatprep.subr.bf16.mxu1 %v1224_v22 }
 0x1bb   : > { %933 = vmatpush2.bf16.msra.mxu1 %v1223_v11 }
 0x1bd   : > { %v958_v21 = vpop.permute.xlu0 %957 }
 0x1be   : > { %935 = vmatmul.mubr.bf16.vlgmr.msra.gmra.mxu1 %v1286_v23 }
 0x1c1   : > { %v798_v45 = vpop.permute.xlu1 %797 }
 0x1c5   : > { %v963_v30 = vpop.permute.xlu1 %962 }
 0x27e   : > { %v936_v25 = vpop.f32.mrf.mxu1 }
 0x27f   : > { %v937_v13 = vadd.f32 %v936_v25, %v793_v10 }
 0x280   : > { %v938_v9 = vpop.f32.mrf.mxu1 }
 0x281   : > { %v939_v40 = vadd.f32 %v938_v9, %v793_v10  ;;  %v945_v14 = vmax.f32 %v937_v13, 0.0 }
 0x282   : > { %v940_v55 = vpop.f32.mrf.mxu1 }
 0x283   : > { %v941_v12 = vadd.f32 %v940_v55, %v798_v45  ;;  %v946_v37 = vmax.f32 %v939_v40, 0.0 }
 0x284   : > { %v942_v15 = vpop.f32.mrf.mxu1 }
 0x285   : > { %v943_v16 = vadd.f32 %v942_v15, %v798_v45  ;;  %v947_v17 = vmax.f32 %v941_v12, 0.0 }
 0x287   : > { %v948_v18 = vmax.f32 %v943_v16, 0.0  ;;  %v951_v24 = vpack.c.bf16 %v947_v17, %v945_v14 }
 0x289   : > { %v952_v20 = vpack.c.bf16 %v948_v18, %v946_v37 }
 0x28b   : > { %987 = vmatprep.subr.bf16.mxu0 %v952_v20 }
 0x28c   : > { %988 = vmatpush1.bf16.msra.mxu0 %v951_v24 }
 0x28f   : > { %1181 = vmatmul.mubr.msk.bf16.vlgmr.msra.gmra.mxu0 %vm350_vm0, %v1289_v19 }
 0x34f   : > { %v1007_v26 = vpop.f32.mrf.mxu0 }
 0x350   : > { %v1008_v27 = vadd.f32 %v1007_v26, %v958_v21 }
 0x351   : > { %v1009_v43 = vpop.f32.mrf.mxu0 }
 0x352   : > { %v1016_v28 = vmax.f32 %v1008_v27, 0.0  ;;  %v1010_v29 = vadd.f32 %v1009_v43, %v958_v21 }
 0x353   : > { %v1011_v31 = vpop.f32.mrf.mxu0 }
 0x354   : > { %v1024_v32 = vadd.f32 %v1016_v28, %v1554_v3  ;;  %v1017_v34 = vmax.f32 %v1010_v29, 0.0  ;;  %v1012_v41 = vadd.f32 %v1011_v31, %v963_v30 }
 0x355   : > { %v1013_v39 = vpop.f32.mrf.mxu0 }
 0x356   : > { %v1028_v44 = vmax.f32 %v1024_v32, 0.0  ;;  %v1025_v36 = vadd.f32 %v1017_v34, %v1550_v1  ;;  %v1018_v46 = vmax.f32 %v1012_v41, 0.0  ;;  %v1014_v50 = vadd.f32 %v1013_v39, %v963_v30 }
 0x358   : > { %1032 = vst [vmem:[%s323_s15] sm:$0xff] %v1028_v44  ;;  %v1029_v51 = vmax.f32 %v1025_v36, 0.0  ;;  %v1026_v47 = vadd.f32 %v1018_v46, %v1558_v5  ;;  %v1019_v53 = vmax.f32 %v1014_v50, 0.0 }
 0x35a   : > { %1033 = vst [vmem:[%s323_s15 + $0x8] sm:$0xff] %v1029_v51  ;;  %v1030_v3 = vmax.f32 %v1026_v47, 0.0  ;;  %v1027_v33 = vadd.f32 %v1019_v53, %v1552_v2 }
 0x35c   : > { %1034 = vst [vmem:[%s323_s15 + $0x10] sm:$0xff] %v1030_v3  ;;  %v1031_v1 = vmax.f32 %v1027_v33, 0.0 }
 0x35e   : > { %1035 = vst [vmem:[%s323_s15 + $0x18] sm:$0xff] %v1031_v1 }
 0x35f   : > { %1331 = shalt.err (!%p1328_p10)
}
 0x360   : > { %s1332_s13 = scalar_lea.hbm %s1815_s10, 512  ;;  %s1336_s16 = scalar_lea.hbm %s1867_s8, 1024 }
 0x361   : > { %p1333_p0 = scmp.ne.s32.totalorder %s1815_s10, %s1332_s13  ;;  %p1337_p1 = scmp.lt.s32.totalorder %s1815_s10, %s1867_s8 }
 0x362   : > { %p1338_p3 = scmp.lt.s32.totalorder %s1336_s16, %s1332_s13 }
 0x363   : > { %p1334_p2 = pnand %p1333_p0, %p1877_p12 }
 0x364   : > { %p1339_p6 = por %p1338_p3, %p1337_p1 }
 0x365   : > { %p1335_p9 = pneg %p1334_p2 }
 0x367   : > { %p1340_p11 = pnand %p1339_p6, %p1335_p9 }
 0x369   : > { %1343 = shalt.err (!%p1340_p11)
}
 0x36a   : > { %s1397_s19 = smov 256  }
 0x36b   : > { %1227 = dma.vmem_to_hbm [thread:$0]  (%p1877_p12), %s1810_s26, 512, %s1815_s10, %s1037_s12, %s1397_s19, %s1397_s19, %s1393_s23  }
 0x36c PF: > { %s1065_s9 = sand.u32 1, %s1370_s27   ;;  %p1878_p13 = scmp.ne.s32.totalorder %s1874_s18, 0 }
 0x36d   : > { %p1879_p4 = scmp.ge.s32.totalorder %s1382_s30, 2  ;;  %s1066_s25 = scalar_lea.sflag [#allocation5], %s1065_s9 }
 0x36f   : > { %p1234_p5 = pnand %p1879_p4, %p1878_p13 }
 0x371   : > { %p1235_p7 = pneg %p1234_p5 }
 0x373   : > { %1365 = dma.done.wait (%p1235_p7), %s1066_s25, 512  }
 0x374   : > { %1367 = vsyncadd (%p1235_p7), %s1066_s25, 4294966784  ;;  %s1880_s17 = sld [smem:[#allocation9_spill]]  ;;  %p21_p8 = scmp.ge.s32.totalorder %s1468_s11, 4  }
 0x375   : > { %s1881_s27 = smov %s1374_s28  ;;  %s1882_s28 = smov %s1378_s29 }
 0x376   : > { %s1884_s30 = smov %s1468_s11  ;;  %23 = sbr.rel (!%p21_p8) target bundleno = 5 (0x5), region = 104 }
 0x37a   : > { %s1883_s29 = smov %s1880_s17 }
 0x37b   :  { %1071 = vsyncpa [#allocation4], 1 }
 0x37c   :  { %1073 = vsyncpa [#allocation4 + $0x1], 1 }
 0x37d   :  { %1074 = vsyncpa [#allocation5], 1 }
 0x37e   :  { %1076 = vsyncpa [#allocation5 + $0x1], 1 }

</bundles_post_ra>
